<compile_context>
chip_gen: v5e
topology: v5e:2x2
jax: 0.10.0
libtpu: 0.0.40
codegen_flags: <defaults>
</compile_context>

<pallas_src>
import functools

import jax
import jax.numpy as jnp
from jax.experimental import pallas as pl
from jax.experimental.pallas import tpu as pltpu

INPUT_DIM = 512
HIDDEN_DIM = INPUT_DIM // 2          # 256
OUTPUT_DIM = 2
OUT_PAD = 128                        # pad last matmul output to a full lane tile
BIAS_ROWS = 8                        # full sublane tile for bias blocks


def _round_up(n, m):
    return ((n + m - 1) // m) * m


# ----------------------------------------------------------------------------
# Kernel: fused MLP  relu(relu(x @ W1 + b1) @ W2 + b2) @ W3 + b3
#   x/W* are bf16, accumulation + bias add + relu in f32.
# ----------------------------------------------------------------------------
def mlp_kernel(x_ref, w1_ref, b1_ref, w2_ref, b2_ref, w3_ref, b3_ref, o_ref):
    x = x_ref[...]                                               # bf16 [bb, 512]

    h1 = jnp.dot(x, w1_ref[...], preferred_element_type=jnp.float32)
    h1 = jnp.maximum(h1 + b1_ref[0], 0.0).astype(jnp.bfloat16)   # [bb, 256]

    h2 = jnp.dot(h1, w2_ref[...], preferred_element_type=jnp.float32)
    h2 = jnp.maximum(h2 + b2_ref[0], 0.0).astype(jnp.bfloat16)   # [bb, 256]

    h3 = jnp.dot(h2, w3_ref[...], preferred_element_type=jnp.float32)
    o_ref[...] = (h3 + b3_ref[0]).astype(o_ref.dtype)            # [bb, 128]


# ----------------------------------------------------------------------------
# Wrapper
# ----------------------------------------------------------------------------
@functools.partial(jax.jit, static_argnames=("block_b",))
def heading_diff_regressor(x, w1, b1, w2, b2, w3p, b3p, *, block_b=256):
    """x: [B, INPUT_DIM] float32 -> [B, OUTPUT_DIM] float32."""
    B, D = x.shape
    assert D == INPUT_DIM
    H = HIDDEN_DIM

    # Effective batch tile: multiple of 8 (sublane), capped at block_b, and chosen
    # so the grid has >= 2 steps whenever B permits (keeps both v7x TCs busy).
    bb = max(8, min(block_b, _round_up(max(B // 2, 1), 8)))
    B_pad = _round_up(B, bb)

    xb = x.astype(jnp.bfloat16)
    if B_pad != B:
        xb = jnp.pad(xb, ((0, B_pad - B), (0, 0)))

    grid = (B_pad // bb,)

    out_padded = pl.pallas_call(
        mlp_kernel,
        out_shape=jax.ShapeDtypeStruct((B_pad, OUT_PAD), jnp.float32),
        grid_spec=pltpu.PrefetchScalarGridSpec(
            num_scalar_prefetch=0,
            grid=grid,
            in_specs=[
                pl.BlockSpec((bb, D), lambda i: (i, 0)),              # x tile (bf16)
                pl.BlockSpec((D, H), lambda i: (0, 0)),               # W1 (bf16)
                pl.BlockSpec((BIAS_ROWS, H), lambda i: (0, 0)),       # b1 (f32, 8 rows)
                pl.BlockSpec((H, H), lambda i: (0, 0)),               # W2 (bf16)
                pl.BlockSpec((BIAS_ROWS, H), lambda i: (0, 0)),       # b2 (f32, 8 rows)
                pl.BlockSpec((H, OUT_PAD), lambda i: (0, 0)),         # W3 padded (bf16)
                pl.BlockSpec((BIAS_ROWS, OUT_PAD), lambda i: (0, 0)), # b3 padded (f32)
            ],
            out_specs=pl.BlockSpec((bb, OUT_PAD), lambda i: (i, 0)),
        ),
        compiler_params=pltpu.CompilerParams(
            dimension_semantics=("parallel",)),
    )(xb, w1, b1, w2, b2, w3p, b3p)

    # Slice away batch padding and the lane padding of the final layer.
    return out_padded[:B, :OUTPUT_DIM]


# ----------------------------------------------------------------------------
# Deterministic parameter init (matches nn.init.orthogonal_ semantics, bias=0)
# ----------------------------------------------------------------------------
def orthogonal_init(key, shape, scale=1.0):
    """Orthogonal init for a PyTorch-layout weight of shape (out, in)."""
    rows, cols = shape
    n_max, n_min = max(rows, cols), min(rows, cols)
    a = jax.random.normal(key, (n_max, n_min), dtype=jnp.float32)
    q, r = jnp.linalg.qr(a)
    q = q * jnp.sign(jnp.diagonal(r))
    if rows < cols:
        q = q.T
    return scale * q[:rows, :cols]


def _bias_tile(b_vec):
    """Replicate a bias row into a full (8, H) sublane tile (f32)."""
    return jnp.broadcast_to(b_vec.astype(jnp.float32)[None, :],
                            (BIAS_ROWS, b_vec.shape[0]))


def make_params(key, init_scale=1.0):
    k1, k2, k3 = jax.random.split(key, 3)
    # PyTorch layout (out, in), then transpose to kernel layout (in, out).
    w1_pt = orthogonal_init(k1, (HIDDEN_DIM, INPUT_DIM), init_scale)
    w2_pt = orthogonal_init(k2, (HIDDEN_DIM, HIDDEN_DIM), init_scale)
    w3_pt = orthogonal_init(k3, (OUTPUT_DIM, HIDDEN_DIM), init_scale)

    w1 = w1_pt.T.astype(jnp.bfloat16)                              # (512, 256)
    b1 = _bias_tile(jnp.zeros((HIDDEN_DIM,), jnp.float32))         # (8, 256)
    w2 = w2_pt.T.astype(jnp.bfloat16)                              # (256, 256)
    b2 = _bias_tile(jnp.zeros((HIDDEN_DIM,), jnp.float32))         # (8, 256)

    # Pad fc3 weight/bias from 2 -> 128 output columns with zeros.
    w3 = w3_pt.T                                                   # (256, 2)
    w3p = jnp.zeros((HIDDEN_DIM, OUT_PAD), jnp.float32).at[:, :OUTPUT_DIM].set(w3)
    w3p = w3p.astype(jnp.bfloat16)                                 # (256, 128)
    b3p = _bias_tile(jnp.zeros((OUT_PAD,), jnp.float32))           # (8, 128)

    return (w1, b1, w2, b2, w3p, b3p), (w1_pt, w2_pt, w3_pt)


def reference_forward(x, w1_pt, w2_pt, w3_pt):
    h = jnp.maximum(x @ w1_pt.T, 0.0)
    h = jnp.maximum(h @ w2_pt.T, 0.0)
    return h @ w3_pt.T


if __name__ == "__main__":
    key = jax.random.PRNGKey(0)
    kx, kp = jax.random.split(key)

    params, pt_weights = make_params(kp, init_scale=1.0)

    # Main path: batch large enough for two 128-row MXU tiles (2 grid steps).
    B = 256
    x = jax.random.normal(kx, (B, INPUT_DIM), dtype=jnp.float32)
    out = jax.block_until_ready(heading_diff_regressor(x, *params))
    assert out.shape == (B, OUTPUT_DIM), out.shape
    ref = reference_forward(x, *pt_weights)
    # bf16 matmul inputs -> relaxed tolerance vs the f32 reference.
    assert jnp.allclose(out, ref, atol=5e-2, rtol=5e-2), (
        float(jnp.max(jnp.abs(out - ref))))

    # Ragged small batch: exercises padding + small-tile path.
    B2 = 20
    x2 = jax.random.normal(jax.random.PRNGKey(1), (B2, INPUT_DIM), dtype=jnp.float32)
    out2 = jax.block_until_ready(heading_diff_regressor(x2, *params))
    assert out2.shape == (B2, OUTPUT_DIM), out2.shape
    ref2 = reference_forward(x2, *pt_weights)
    assert jnp.allclose(out2, ref2, atol=5e-2, rtol=5e-2), (
        float(jnp.max(jnp.abs(out2 - ref2))))

    print("KERNEL_OK")
</pallas_src>

<mosaic_0001>
module attributes {stable_mosaic.version = 11 : i64} {
  func.func @mlp_kernel(%arg0: i32, %arg1: memref<128x512xbf16, #tpu.memory_space<vmem>>, %arg2: memref<512x256xbf16, #tpu.memory_space<vmem>>, %arg3: memref<8x256xf32, #tpu.memory_space<vmem>>, %arg4: memref<256x256xbf16, #tpu.memory_space<vmem>>, %arg5: memref<8x256xf32, #tpu.memory_space<vmem>>, %arg6: memref<256x128xbf16, #tpu.memory_space<vmem>>, %arg7: memref<8x128xf32, #tpu.memory_space<vmem>>, %arg8: memref<128x128xf32, #tpu.memory_space<vmem>>) attributes {dimension_semantics = [#tpu.dimension_semantics<parallel>], iteration_bounds = array<i64: 2>, scalar_prefetch = 0 : i64, scratch_operands = 0 : i64, tpu.core_type = #tpu.core_type<tc>, window_params = [{transform_indices = @transform_0, window_bounds = array<i64: 128, 512>}, {pipeline_mode = #tpu.pipeline_mode<synchronous>, transform_indices = @transform_1, window_bounds = array<i64: 512, 256>}, {pipeline_mode = #tpu.pipeline_mode<synchronous>, transform_indices = @transform_2, window_bounds = array<i64: 8, 256>}, {pipeline_mode = #tpu.pipeline_mode<synchronous>, transform_indices = @transform_3, window_bounds = array<i64: 256, 256>}, {pipeline_mode = #tpu.pipeline_mode<synchronous>, transform_indices = @transform_4, window_bounds = array<i64: 8, 256>}, {pipeline_mode = #tpu.pipeline_mode<synchronous>, transform_indices = @transform_5, window_bounds = array<i64: 256, 128>}, {pipeline_mode = #tpu.pipeline_mode<synchronous>, transform_indices = @transform_6, window_bounds = array<i64: 8, 128>}, {transform_indices = @transform_7, window_bounds = array<i64: 128, 128>}]} {
    %c0 = arith.constant 0 : index
    %c0_0 = arith.constant 0 : index
    %0 = vector.load %arg1[%c0, %c0_0] : memref<128x512xbf16, #tpu.memory_space<vmem>>, vector<128x512xbf16>
    %c0_1 = arith.constant 0 : index
    %c0_2 = arith.constant 0 : index
    %1 = vector.load %arg2[%c0_1, %c0_2] : memref<512x256xbf16, #tpu.memory_space<vmem>>, vector<512x256xbf16>
    %cst = arith.constant dense<0.000000e+00> : vector<128x256xf32>
    %2 = tpu.matmul %0, %1, %cst {dimension_numbers = #tpu.dot_dimension_numbers<[1], [0], [0], [1], [0, 0, 1, 1], [], []>} : vector<128x512xbf16>, vector<512x256xbf16>, vector<128x256xf32> -> vector<128x256xf32>
    %c0_3 = arith.constant 0 : index
    %c0_4 = arith.constant 0 : index
    %3 = vector.load %arg3[%c0_3, %c0_4] : memref<8x256xf32, #tpu.memory_space<vmem>>, vector<1x256xf32>
    %4 = vector.shape_cast %3 : vector<1x256xf32> to vector<256xf32>
    %5 = vector.shape_cast %4 : vector<256xf32> to vector<1x256xf32>
    %6 = vector.broadcast %5 : vector<1x256xf32> to vector<128x256xf32>
    %7 = arith.addf %2, %6 : vector<128x256xf32>
    %cst_5 = arith.constant 0.000000e+00 : f32
    %8 = vector.broadcast %cst_5 : f32 to vector<128x256xf32>
    %9 = arith.maximumf %7, %8 : vector<128x256xf32>
    %10 = arith.truncf %9 : vector<128x256xf32> to vector<128x256xbf16>
    %c0_6 = arith.constant 0 : index
    %c0_7 = arith.constant 0 : index
    %11 = vector.load %arg4[%c0_6, %c0_7] : memref<256x256xbf16, #tpu.memory_space<vmem>>, vector<256x256xbf16>
    %cst_8 = arith.constant dense<0.000000e+00> : vector<128x256xf32>
    %12 = tpu.matmul %10, %11, %cst_8 {dimension_numbers = #tpu.dot_dimension_numbers<[1], [0], [0], [1], [0, 0, 1, 1], [], []>} : vector<128x256xbf16>, vector<256x256xbf16>, vector<128x256xf32> -> vector<128x256xf32>
    %c0_9 = arith.constant 0 : index
    %c0_10 = arith.constant 0 : index
    %13 = vector.load %arg5[%c0_9, %c0_10] : memref<8x256xf32, #tpu.memory_space<vmem>>, vector<1x256xf32>
    %14 = vector.shape_cast %13 : vector<1x256xf32> to vector<256xf32>
    %15 = vector.shape_cast %14 : vector<256xf32> to vector<1x256xf32>
    %16 = vector.broadcast %15 : vector<1x256xf32> to vector<128x256xf32>
    %17 = arith.addf %12, %16 : vector<128x256xf32>
    %cst_11 = arith.constant 0.000000e+00 : f32
    %18 = vector.broadcast %cst_11 : f32 to vector<128x256xf32>
    %19 = arith.maximumf %17, %18 : vector<128x256xf32>
    %20 = arith.truncf %19 : vector<128x256xf32> to vector<128x256xbf16>
    %c0_12 = arith.constant 0 : index
    %c0_13 = arith.constant 0 : index
    %21 = vector.load %arg6[%c0_12, %c0_13] : memref<256x128xbf16, #tpu.memory_space<vmem>>, vector<256x128xbf16>
    %cst_14 = arith.constant dense<0.000000e+00> : vector<128x128xf32>
    %22 = tpu.matmul %20, %21, %cst_14 {dimension_numbers = #tpu.dot_dimension_numbers<[1], [0], [0], [1], [0, 0, 1, 1], [], []>} : vector<128x256xbf16>, vector<256x128xbf16>, vector<128x128xf32> -> vector<128x128xf32>
    %c0_15 = arith.constant 0 : index
    %c0_16 = arith.constant 0 : index
    %23 = vector.load %arg7[%c0_15, %c0_16] : memref<8x128xf32, #tpu.memory_space<vmem>>, vector<1x128xf32>
    %24 = vector.shape_cast %23 : vector<1x128xf32> to vector<128xf32>
    %25 = vector.shape_cast %24 : vector<128xf32> to vector<1x128xf32>
    %26 = vector.broadcast %25 : vector<1x128xf32> to vector<128x128xf32>
    %27 = arith.addf %22, %26 : vector<128x128xf32>
    %c0_17 = arith.constant 0 : index
    %c0_18 = arith.constant 0 : index
    %28 = vector.load %arg8[%c0_17, %c0_18] : memref<128x128xf32, #tpu.memory_space<vmem>>, vector<128x128xf32>
    tpu.vector_store %arg8[%c0_17, %c0_18], %27 {strides = array<i32>} : memref<128x128xf32, #tpu.memory_space<vmem>>, vector<128x128xf32>,
    return
  }
  func.func @transform_0(%arg0: i32) -> (i32, i32) {
    %c0_i32 = arith.constant 0 : i32
    %c0_i32_0 = arith.constant 0 : i32
    return %arg0, %c0_i32 : i32, i32
  }
  func.func @transform_1(%arg0: i32) -> (i32, i32) {
    %c0_i32 = arith.constant 0 : i32
    %c0_i32_0 = arith.constant 0 : i32
    %c0_i32_1 = arith.constant 0 : i32
    return %c0_i32, %c0_i32_0 : i32, i32
  }
  func.func @transform_2(%arg0: i32) -> (i32, i32) {
    %c0_i32 = arith.constant 0 : i32
    %c0_i32_0 = arith.constant 0 : i32
    %c0_i32_1 = arith.constant 0 : i32
    return %c0_i32, %c0_i32_0 : i32, i32
  }
  func.func @transform_3(%arg0: i32) -> (i32, i32) {
    %c0_i32 = arith.constant 0 : i32
    %c0_i32_0 = arith.constant 0 : i32
    %c0_i32_1 = arith.constant 0 : i32
    return %c0_i32, %c0_i32_0 : i32, i32
  }
  func.func @transform_4(%arg0: i32) -> (i32, i32) {
    %c0_i32 = arith.constant 0 : i32
    %c0_i32_0 = arith.constant 0 : i32
    %c0_i32_1 = arith.constant 0 : i32
    return %c0_i32, %c0_i32_0 : i32, i32
  }
  func.func @transform_5(%arg0: i32) -> (i32, i32) {
    %c0_i32 = arith.constant 0 : i32
    %c0_i32_0 = arith.constant 0 : i32
    %c0_i32_1 = arith.constant 0 : i32
    return %c0_i32, %c0_i32_0 : i32, i32
  }
  func.func @transform_6(%arg0: i32) -> (i32, i32) {
    %c0_i32 = arith.constant 0 : i32
    %c0_i32_0 = arith.constant 0 : i32
    %c0_i32_1 = arith.constant 0 : i32
    return %c0_i32, %c0_i32_0 : i32, i32
  }
  func.func @transform_7(%arg0: i32) -> (i32, i32) {
    %c0_i32 = arith.constant 0 : i32
    %c0_i32_0 = arith.constant 0 : i32
    return %arg0, %c0_i32 : i32, i32
  }
}

</mosaic_0001>

<bundles_post_ra>
// kernel: heading_diff_regressor.1
= control target key start
LH: loop header
LB: loop body
LE: loop exit
PB: predicated region body
PF: predicated region fallthrough
CT: control target
= control target key end

     0   :  { %s2855_s24 = smov 0   ;;  %s3897_s0 = inlined_call_operand.vmem [shape: bf16[256,512], index: 0, kind: input, shape index: {}]   ;;  %s3898_s1 = inlined_call_operand.vmem [shape: bf16[512,256], index: 1, kind: input, shape index: {}]   ;;  %s3899_s2 = inlined_call_operand.vmem [shape: f32[8,256], index: 2, kind: input, shape index: {}]   ;;  %s3900_s3 = inlined_call_operand.vmem [shape: bf16[256,256], index: 3, kind: input, shape index: {}]   ;;  %s3901_s4 = inlined_call_operand.vmem [shape: f32[8,256], index: 4, kind: input, shape index: {}]   ;;  %s3902_s5 = inlined_call_operand.vmem [shape: bf16[256,128], index: 5, kind: input, shape index: {}]   ;;  %s3903_s6 = inlined_call_operand.vmem [shape: f32[8,128], index: 6, kind: input, shape index: {}]   ;;  %s3904_s7 = inlined_call_operand.vmem [shape: f32[256,128], index: 7, kind: output, shape index: {}]  }
   0x1 LB: > { %s2049_s25 = sadd.s32 4294967295, %s2813_s24   ;;  %p2053_p0 = scmp.ge.s32.totalorder %s2813_s24, 1  ;;  %s2813_s24 = sphi %s2855_s24, %s17_s24  }
   0x2   : > { %p239_p1 = scmp.lt.s32.totalorder %s2813_s24, 3 }
   0x4   : > { %p240_p2 = pnand %p2053_p0, %p239_p1 }
   0x5   : > { %s2054_s14 = sshll.u32 (!%p240_p2), %s2049_s25, 4 }
   0x6   : > { %243 = sbr.rel (%p240_p2) target bundleno = 780 (0x30c), region = 48  ;;  %p273_p3 = scmp.lt.s32.totalorder (!%p240_p2), %s2054_s14, 31 }
   0xb   : > { %v2245_v0 = vld [vmem:[%s3898_s1 + $0x70] sm:$0xf]  ;;  %v2685_v1 = vld [vmem:[%s3898_s1 + $0x74] sm:$0xf0]  ;;  %v2237_v5 = vld [vmem:[%s3898_s1 + $0x60] sm:$0xf] }
   0xc   : > { %v2309_v2 = vld [vmem:[%s3898_s1 + $0xf0] sm:$0xf]  ;;  %v2246_v3 = vor.u32 %v2685_v1, %v2245_v0  ;;  %v2701_v4 = vld [vmem:[%s3898_s1 + $0xf4] sm:$0xf0]  ;;  %v2683_v6 = vld [vmem:[%s3898_s1 + $0x64] sm:$0xf0] }
   0xd   : > { %v2310_v7 = vor.u32 %v2701_v4, %v2309_v2  ;;  %v2301_v8 = vld [vmem:[%s3898_s1 + $0xe0] sm:$0xf]  ;;  %v2699_v9 = vld [vmem:[%s3898_s1 + $0xe4] sm:$0xf0]  ;;  %v2238_v10 = vor.u32 %v2683_v6, %v2237_v5  ;;  %v2229_v12 = vld [vmem:[%s3898_s1 + $0x50] sm:$0xf] }
   0xe   : > { %2782 = vmatpush.bf16.msra.mxu2 %v2246_v3  ;;  %867 = vmatpush.bf16.msra.mxu0 %v2246_v3  ;;  %v2302_v11 = vor.u32 %v2699_v9, %v2301_v8  ;;  %v2681_v13 = vld [vmem:[%s3898_s1 + $0x54] sm:$0xf0]  ;;  %v2293_v14 = vld [vmem:[%s3898_s1 + $0xd0] sm:$0xf]  ;;  %v2221_v18 = vld [vmem:[%s3898_s1 + $0x40] sm:$0xf] }
   0xf   : > { %2790 = vmatpush.bf16.msra.mxu3 %v2310_v7  ;;  %916 = vmatpush.bf16.msra.mxu1 %v2310_v7  ;;  %v2697_v15 = vld [vmem:[%s3898_s1 + $0xd4] sm:$0xf0]  ;;  %v2230_v16 = vor.u32 %v2681_v13, %v2229_v12  ;;  %v2679_v19 = vld [vmem:[%s3898_s1 + $0x44] sm:$0xf0]  ;;  %v2285_v20 = vld [vmem:[%s3898_s1 + $0xc0] sm:$0xf] }
  0x10   : > { %v2294_v17 = vor.u32 %v2697_v15, %v2293_v14  ;;  %v2695_v21 = vld [vmem:[%s3898_s1 + $0xc4] sm:$0xf0]  ;;  %v2222_v22 = vor.u32 %v2679_v19, %v2221_v18  ;;  %v2213_v24 = vld [vmem:[%s3898_s1 + $0x30] sm:$0xf]  ;;  %v2677_v25 = vld [vmem:[%s3898_s1 + $0x34] sm:$0xf0] }
  0x11   : > { %v2286_v23 = vor.u32 %v2695_v21, %v2285_v20  ;;  %v2277_v26 = vld [vmem:[%s3898_s1 + $0xb0] sm:$0xf]  ;;  %v2693_v27 = vld [vmem:[%s3898_s1 + $0xb4] sm:$0xf0]  ;;  %v2214_v28 = vor.u32 %v2677_v25, %v2213_v24  ;;  %v2205_v30 = vld [vmem:[%s3898_s1 + $0x20] sm:$0xf] }
  0x12   : > { %2783 = vmatpush.bf16.msra.mxu2 %v2238_v10  ;;  %868 = vmatpush.bf16.msra.mxu0 %v2238_v10  ;;  %v2278_v29 = vor.u32 %v2693_v27, %v2277_v26  ;;  %v2675_v31 = vld [vmem:[%s3898_s1 + $0x24] sm:$0xf0]  ;;  %s3906_s14 = smov (!%p273_p3, %s2054_s14), 31  ;;  %v2269_v32 = vld [vmem:[%s3898_s1 + $0xa0] sm:$0xf] }
  0x13   : > { %2791 = vmatpush.bf16.msra.mxu3 %v2302_v11  ;;  %917 = vmatpush.bf16.msra.mxu1 %v2302_v11  ;;  %v2691_v33 = vld [vmem:[%s3898_s1 + $0xa4] sm:$0xf0]  ;;  %v2206_v34 = vor.u32 %v2675_v31, %v2205_v30  ;;  %v2197_v36 = vld [vmem:[%s3898_s1 + $0x10] sm:$0xf]  ;;  %v2673_v37 = vld [vmem:[%s3898_s1 + $0x14] sm:$0xf0] }
  0x14   : > { %v2270_v35 = vor.u32 %v2691_v33, %v2269_v32  ;;  %s2637_s13 = sshll.u32 %s3906_s14, 4  ;;  %v2261_v38 = vld [vmem:[%s3898_s1 + $0x90] sm:$0xf]  ;;  %v2689_v39 = vld [vmem:[%s3898_s1 + $0x94] sm:$0xf0]  ;;  %v2198_v40 = vor.u32 %v2673_v37, %v2197_v36  ;;  %s2058_s20 = sshll.u32 %s3906_s14, 3 }
  0x15   : > { %s2955_s25 = scalar_lea.vmem %s3897_s0, %s2637_s13  ;;  %v2262_v41 = vor.u32 %v2689_v39, %v2261_v38  ;;  %v2189_v42 = vld [vmem:[%s3898_s1] sm:$0xf]  ;;  %v2671_v43 = vld [vmem:[%s3898_s1 + $0x4] sm:$0xf0]  ;;  %v2373_v46 = vld [vmem:[%s3898_s1 + $0x170] sm:$0xf]  ;;  %s3861_s23 = scalar_lea.vmem %s3904_s7, %s2058_s20 }
  0x16   : > { %2784 = vmatpush.bf16.msra.mxu2 %v2230_v16  ;;  %869 = vmatpush.bf16.msra.mxu0 %v2230_v16  ;;  %v2253_v44 = vld [vmem:[%s3898_s1 + $0x80] sm:$0xf]  ;;  %v2687_v45 = vld [vmem:[%s3898_s1 + $0x84] sm:$0xf0]  ;;  %v2717_v47 = vld [vmem:[%s3898_s1 + $0x174] sm:$0xf0]  ;;  %v2190_v51 = vor.u32 %v2671_v43, %v2189_v42 }
  0x17   : > { %2792 = vmatpush.bf16.msra.mxu3 %v2294_v17  ;;  %918 = vmatpush.bf16.msra.mxu1 %v2294_v17  ;;  %v2125_v48 = vld [vmem:[%s2955_s25 + $0x80] sm:$0xf]  ;;  %v2437_v49 = vld [vmem:[%s3898_s1 + $0x1f0] sm:$0xf]  ;;  %v2733_v50 = vld [vmem:[%s3898_s1 + $0x1f4] sm:$0xf0]  ;;  %v2254_v55 = vor.u32 %v2687_v45, %v2253_v44  ;;  %v2374_v58 = vor.u32 %v2717_v47, %v2373_v46 }
  0x18   : > { %v2656_v52 = vld [vmem:[%s2955_s25 + $0x8c] sm:$0xf0]  ;;  %v2061_v53 = vld [vmem:[%s2955_s25] sm:$0xf]  ;;  %v2654_v56 = vld [vmem:[%s2955_s25 + $0x84] sm:$0xf]  ;;  %v2438_v59 = vor.u32 %v2733_v50, %v2437_v49 }
  0x19   : > { %v2640_v54 = vld [vmem:[%s2955_s25 + $0xc] sm:$0xf0]  ;;  %v2127_v57 = vld [vmem:[%s2955_s25 + $0x90] sm:$0xf0]  ;;  %v2365_v60 = vld [vmem:[%s3898_s1 + $0x160] sm:$0xf]  ;;  %v2993_v62 = vor.u32 %v2656_v52, %v2125_v48 }
  0x1a   : > { %2785 = vmatpush.bf16.msra.mxu2 %v2222_v22  ;;  %870 = vmatpush.bf16.msra.mxu0 %v2222_v22  ;;  %v2715_v61 = vld [vmem:[%s3898_s1 + $0x164] sm:$0xf0]  ;;  %v2429_v63 = vld [vmem:[%s3898_s1 + $0x1e0] sm:$0xf]  ;;  %v3001_v1 = vor.u32 %v2640_v54, %v2061_v53  ;;  %v3003_v2 = vor.u32 %v2654_v56, %v2127_v57  ;;  %v2357_v5 = vld [vmem:[%s3898_s1 + $0x150] sm:$0xf] }
  0x1b   : > { %2793 = vmatpush.bf16.msra.mxu3 %v2286_v23  ;;  %919 = vmatpush.bf16.msra.mxu1 %v2286_v23  ;;  %v2731_v0 = vld [vmem:[%s3898_s1 + $0x1e4] sm:$0xf0]  ;;  %v2366_v3 = vor.u32 %v2715_v61, %v2365_v60  ;;  %v2713_v6 = vld [vmem:[%s3898_s1 + $0x154] sm:$0xf0]  ;;  %v2421_v7 = vld [vmem:[%s3898_s1 + $0x1d0] sm:$0xf] }
  0x1c   : > { %v2430_v4 = vor.u32 %v2731_v0, %v2429_v63  ;;  %v2729_v8 = vld [vmem:[%s3898_s1 + $0x1d4] sm:$0xf0]  ;;  %v2358_v9 = vor.u32 %v2713_v6, %v2357_v5  ;;  %v2349_v11 = vld [vmem:[%s3898_s1 + $0x140] sm:$0xf]  ;;  %v2711_v12 = vld [vmem:[%s3898_s1 + $0x144] sm:$0xf0] }
  0x1d   : > { %v2422_v10 = vor.u32 %v2729_v8, %v2421_v7  ;;  %v2413_v13 = vld [vmem:[%s3898_s1 + $0x1c0] sm:$0xf]  ;;  %v2727_v14 = vld [vmem:[%s3898_s1 + $0x1c4] sm:$0xf0]  ;;  %v2350_v15 = vor.u32 %v2711_v12, %v2349_v11  ;;  %v2341_v17 = vld [vmem:[%s3898_s1 + $0x130] sm:$0xf] }
  0x1e   : > { %2786 = vmatpush.bf16.msra.mxu2 %v2214_v28  ;;  %871 = vmatpush.bf16.msra.mxu0 %v2214_v28  ;;  %v2414_v16 = vor.u32 %v2727_v14, %v2413_v13  ;;  %v2709_v18 = vld [vmem:[%s3898_s1 + $0x134] sm:$0xf0]  ;;  %v2141_v19 = vld [vmem:[%s2955_s25 + $0xa0] sm:$0xf]  ;;  %v2405_v20 = vld [vmem:[%s3898_s1 + $0x1b0] sm:$0xf] }
  0x1f   : > { %2794 = vmatpush.bf16.msra.mxu3 %v2278_v29  ;;  %920 = vmatpush.bf16.msra.mxu1 %v2278_v29  ;;  %v2725_v21 = vld [vmem:[%s3898_s1 + $0x1b4] sm:$0xf0]  ;;  %v2660_v22 = vld [vmem:[%s2955_s25 + $0xac] sm:$0xf0]  ;;  %v2077_v23 = vld [vmem:[%s2955_s25 + $0x20] sm:$0xf]  ;;  %v2342_v27 = vor.u32 %v2709_v18, %v2341_v17 }
  0x20   : > { %v2644_v24 = vld [vmem:[%s2955_s25 + $0x2c] sm:$0xf0]  ;;  %v2658_v25 = vld [vmem:[%s2955_s25 + $0xa4] sm:$0xf]  ;;  %v2143_v26 = vld [vmem:[%s2955_s25 + $0xb0] sm:$0xf0]  ;;  %v2406_v28 = vor.u32 %v2725_v21, %v2405_v20  ;;  %v3056_v31 = vor.u32 %v2660_v22, %v2141_v19 }
  0x21   : > { %v2333_v29 = vld [vmem:[%s3898_s1 + $0x120] sm:$0xf]  ;;  %v2707_v30 = vld [vmem:[%s3898_s1 + $0x124] sm:$0xf0]  ;;  %v3058_v32 = vor.u32 %v2644_v24, %v2077_v23  ;;  %v2325_v38 = vld [vmem:[%s3898_s1 + $0x110] sm:$0xf] }
  0x22   : > { %2787 = vmatpush.bf16.msra.mxu2 %v2206_v34  ;;  %872 = vmatpush.bf16.msra.mxu0 %v2206_v34  ;;  %v2397_v33 = vld [vmem:[%s3898_s1 + $0x1a0] sm:$0xf]  ;;  %v2723_v34 = vld [vmem:[%s3898_s1 + $0x1a4] sm:$0xf0]  ;;  %v2334_v36 = vor.u32 %v2707_v30, %v2333_v29  ;;  %v2705_v39 = vld [vmem:[%s3898_s1 + $0x114] sm:$0xf0] }
  0x23   : > { %2795 = vmatpush.bf16.msra.mxu3 %v2270_v35  ;;  %921 = vmatpush.bf16.msra.mxu1 %v2270_v35  ;;  %v3066_v35 = vor.u32 %v2658_v25, %v2143_v26  ;;  %v2398_v37 = vor.u32 %v2723_v34, %v2397_v33  ;;  %v2721_v42 = vld [vmem:[%s3898_s1 + $0x194] sm:$0xf0]  ;;  %v2684_v44 = vld [vmem:[%s3898_s1 + $0x74] sm:$0xf]  ;;  %v2247_v45 = vld [vmem:[%s3898_s1 + $0x78] sm:$0xf0] }
  0x24   : > { %v2317_v46 = vld [vmem:[%s3898_s1 + $0x100] sm:$0xf]  ;;  %v2250_v47 = vor.u32 %v2684_v44, %v2247_v45  ;;  %v2703_v48 = vld [vmem:[%s3898_s1 + $0x104] sm:$0xf0]  ;;  %v2682_v49 = vld [vmem:[%s3898_s1 + $0x64] sm:$0xf] }
  0x25   : > { %v2239_v50 = vld [vmem:[%s3898_s1 + $0x68] sm:$0xf0]  ;;  %v2719_v52 = vld [vmem:[%s3898_s1 + $0x184] sm:$0xf0]  ;;  %v2318_v53 = vor.u32 %v2703_v48, %v2317_v46  ;;  %v2680_v56 = vld [vmem:[%s3898_s1 + $0x54] sm:$0xf] }
  0x26   : > { %2788 = vmatpush.bf16.msra.mxu2 %v2198_v40  ;;  %873 = vmatpush.bf16.msra.mxu0 %v2198_v40  ;;  %v2389_v40 = vld [vmem:[%s3898_s1 + $0x190] sm:$0xf]  ;;  %v2242_v54 = vor.u32 %v2682_v49, %v2239_v50  ;;  %v2231_v57 = vld [vmem:[%s3898_s1 + $0x58] sm:$0xf0]  ;;  %v2093_v60 = vld [vmem:[%s2955_s25 + $0x40] sm:$0xf] }
  0x27   : > { %2796 = vmatpush.bf16.msra.mxu3 %v2262_v41  ;;  %922 = vmatpush.bf16.msra.mxu1 %v2262_v41  ;;  %v2326_v41 = vor.u32 %v2705_v39, %v2325_v38  ;;  %v2390_v43 = vor.u32 %v2721_v42, %v2389_v40  ;;  %v2648_v61 = vld [vmem:[%s2955_s25 + $0x4c] sm:$0xf0]  ;;  %v2662_v63 = vld [vmem:[%s2955_s25 + $0xc4] sm:$0xf]  ;;  %v2159_v0 = vld [vmem:[%s2955_s25 + $0xd0] sm:$0xf0] }
  0x28   : > { %v3121_v5 = vor.u32 %v2648_v61, %v2093_v60  ;;  %v3123_v6 = vor.u32 %v2662_v63, %v2159_v0  ;;  %v2678_v7 = vld [vmem:[%s3898_s1 + $0x44] sm:$0xf]  ;;  %v2223_v8 = vld [vmem:[%s3898_s1 + $0x48] sm:$0xf0]  ;;  %v2375_v11 = vld [vmem:[%s3898_s1 + $0x178] sm:$0xf0] }
  0x29   : > { %v2732_v12 = vld [vmem:[%s3898_s1 + $0x1f4] sm:$0xf]  ;;  %v2439_v14 = vld [vmem:[%s3898_s1 + $0x1f8] sm:$0xf0]  ;;  %v2674_v21 = vld [vmem:[%s3898_s1 + $0x24] sm:$0xf] }
  0x2a   : > { %2789 = vmatpush.bf16.msra.mxu2 %v2190_v51  ;;  %874 = vmatpush.bf16.msra.mxu0 %v2190_v51  ;;  %v2381_v51 = vld [vmem:[%s3898_s1 + $0x180] sm:$0xf]  ;;  %v2063_v17 = vld [vmem:[%s2955_s25 + $0x10] sm:$0xf0]  ;;  %v2215_v20 = vld [vmem:[%s3898_s1 + $0x38] sm:$0xf0] }
  0x2b   : > { %2797 = vmatpush.bf16.msra.mxu3 %v2254_v55  ;;  %923 = vmatpush.bf16.msra.mxu1 %v2254_v55  ;;  %v2382_v55 = vor.u32 %v2719_v52, %v2381_v51  ;;  %v2676_v18 = vld [vmem:[%s3898_s1 + $0x34] sm:$0xf]  ;;  %v2207_v22 = vld [vmem:[%s3898_s1 + $0x28] sm:$0xf0]  ;;  %v2173_v25 = vld [vmem:[%s2955_s25 + $0xe0] sm:$0xf] }
  0x2c   : > { %v2218_v23 = vor.u32 %v2676_v18, %v2215_v20  ;;  %v2210_v24 = vor.u32 %v2674_v21, %v2207_v22  ;;  %v2672_v26 = vld [vmem:[%s3898_s1 + $0x14] sm:$0xf]  ;;  %v2109_v29 = vld [vmem:[%s2955_s25 + $0x60] sm:$0xf]  ;;  %v2652_v30 = vld [vmem:[%s2955_s25 + $0x6c] sm:$0xf0] }
  0x2d   : > { %895 = vmatmul.bf16.vlgmr.msra.gmra.mxu2 %v2993_v62  ;;  %875 = vmatmul.bf16.vlgmr.msra.gmra.mxu0 %v3001_v1  ;;  %v2666_v33 = vld [vmem:[%s2955_s25 + $0xe4] sm:$0xf]  ;;  %v2175_v34 = vld [vmem:[%s2955_s25 + $0xf0] sm:$0xf0]  ;;  %v3177_v38 = vor.u32 %v2652_v30, %v2109_v29  ;;  %v2367_v44 = vld [vmem:[%s3898_s1 + $0x168] sm:$0xf0] }
  0x2e   : > { %965 = vmatpush.bf16.msrb.mxu2 %v2374_v58  ;;  %944 = vmatmul.bf16.vlgmr.msra.gmra.mxu3 %v3003_v2  ;;  %v2157_v58 = vld [vmem:[%s2955_s25 + $0xc0] sm:$0xf]  ;;  %v3179_v39 = vor.u32 %v2666_v33, %v2175_v34  ;;  %v2670_v40 = vld [vmem:[%s3898_s1 + $0x4] sm:$0xf]  ;;  %v2079_v49 = vld [vmem:[%s2955_s25 + $0x30] sm:$0xf0] }
  0x2f   : > { %1014 = vmatpush.bf16.msrb.mxu3 %v2438_v59  ;;  %1063 = vmatpush.bf16.msrb.mxu0 %v2250_v47  ;;  %v2664_v59 = vld [vmem:[%s2955_s25 + $0xcc] sm:$0xf0]  ;;  %v2730_v45 = vld [vmem:[%s3898_s1 + $0x1e4] sm:$0xf]  ;;  %v2431_v47 = vld [vmem:[%s3898_s1 + $0x1e8] sm:$0xf0] }
  0x30   : > { %v2642_v48 = vld [vmem:[%s2955_s25 + $0x24] sm:$0xf]  ;;  %v2434_v50 = vor.u32 %v2730_v45, %v2431_v47  ;;  %v2069_v52 = vld [vmem:[%s2955_s25 + $0x8] sm:$0xf]  ;;  %v2728_v60 = vld [vmem:[%s3898_s1 + $0x1d4] sm:$0xf] }
  0x31   : > { %v3204_v51 = vor.u32 %v2642_v48, %v2079_v49  ;;  %v2646_v63 = vld [vmem:[%s2955_s25 + $0x44] sm:$0xf]  ;;  %v2095_v0 = vld [vmem:[%s2955_s25 + $0x50] sm:$0xf0]  ;;  %v2343_v30 = vld [vmem:[%s3898_s1 + $0x138] sm:$0xf0] }
  0x32   : > { %966 = vmatpush.bf16.msrb.mxu2 %v2366_v3  ;;  %v2234_v3 = vor.u32 %v2680_v56, %v2231_v57  ;;  %v2650_v18 = vld [vmem:[%s2955_s25 + $0x64] sm:$0xf]  ;;  %v2111_v20 = vld [vmem:[%s2955_s25 + $0x70] sm:$0xf0]  ;;  %v2651_v45 = vld [vmem:[%s2955_s25 + $0x6c] sm:$0xf] }
  0x33   : > { %1015 = vmatpush.bf16.msrb.mxu3 %v2430_v4  ;;  %1064 = vmatpush.bf16.msrb.mxu0 %v2242_v54  ;;  %v3119_v4 = vor.u32 %v2664_v59, %v2157_v58  ;;  %v2639_v54 = vld [vmem:[%s2955_s25 + $0xc] sm:$0xf]  ;;  %v2712_v58 = vld [vmem:[%s3898_s1 + $0x154] sm:$0xf]  ;;  %v2359_v59 = vld [vmem:[%s3898_s1 + $0x158] sm:$0xf0]  ;;  %v3260_v22 = vor.u32 %v2650_v18, %v2111_v20 }
  0x34   : > { %v2362_v61 = vor.u32 %v2712_v58, %v2359_v59  ;;  %v2708_v29 = vld [vmem:[%s3898_s1 + $0x134] sm:$0xf]  ;;  %v2698_v49 = vld [vmem:[%s3898_s1 + $0xe4] sm:$0xf]  ;;  %v2327_v18 = vld [vmem:[%s3898_s1 + $0x118] sm:$0xf0] }
  0x35   : > { %v2724_v33 = vld [vmem:[%s3898_s1 + $0x1b4] sm:$0xf]  ;;  %v2346_v34 = vor.u32 %v2708_v29, %v2343_v30 }
  0x36   : > { %967 = vmatpush.bf16.msrb.mxu2 %v2358_v9  ;;  %v2226_v9 = vor.u32 %v2678_v7, %v2223_v8  ;;  %v3232_v7 = vor.u32 %v2646_v63, %v2095_v0  ;;  %v2085_v8 = vld [vmem:[%s2955_s25 + $0x28] sm:$0xf]  ;;  %v2657_v0 = vld [vmem:[%s2955_s25 + $0x94] sm:$0xf0]  ;;  %v2720_v20 = vld [vmem:[%s3898_s1 + $0x194] sm:$0xf] }
  0x37   : > { %1016 = vmatpush.bf16.msrb.mxu3 %v2422_v10  ;;  %1065 = vmatpush.bf16.msrb.mxu0 %v2234_v3  ;;  %v2716_v10 = vld [vmem:[%s3898_s1 + $0x174] sm:$0xf]  ;;  %v2133_v63 = vld [vmem:[%s2955_s25 + $0x88] sm:$0xf] }
  0x38   : > { %v2378_v13 = vor.u32 %v2716_v10, %v2375_v11  ;;  %v2643_v10 = vld [vmem:[%s2955_s25 + $0x2c] sm:$0xf]  ;;  %v2087_v11 = vld [vmem:[%s2955_s25 + $0x38] sm:$0xf0]  ;;  %v2692_v30 = vld [vmem:[%s3898_s1 + $0xb4] sm:$0xf] }
  0x3a   : > { %968 = vmatpush.bf16.msrb.mxu2 %v2350_v15  ;;  %v2442_v15 = vor.u32 %v2732_v12, %v2439_v14  ;;  %v2710_v14 = vld [vmem:[%s3898_s1 + $0x144] sm:$0xf] }
  0x3b   : > { %1017 = vmatpush.bf16.msrb.mxu3 %v2414_v16  ;;  %1066 = vmatpush.bf16.msrb.mxu0 %v2226_v9  ;;  %v2638_v16 = vld [vmem:[%s2955_s25 + $0x4] sm:$0xf]  ;;  %v2645_v9 = vld [vmem:[%s2955_s25 + $0x34] sm:$0xf0] }
  0x3c   : > { %v3151_v19 = vor.u32 %v2638_v16, %v2063_v17  ;;  %v3239_v12 = vor.u32 %v2645_v9, %v2085_v8  ;;  %v2726_v16 = vld [vmem:[%s3898_s1 + $0x1c4] sm:$0xf]  ;;  %v2135_v8 = vld [vmem:[%s2955_s25 + $0x98] sm:$0xf0]  ;;  %v3331_v9 = vor.u32 %v2657_v0, %v2133_v63  ;;  %v2501_v63 = vld [vmem:[%s3900_s3 + $0x70] sm:$0xf] }
  0x3d   : > { %900 = vmatmul.bf16.gmra.mxu2 %v3056_v31  ;;  %880 = vmatmul.bf16.gmra.mxu0 %v3058_v32 }
  0x3e   : > { %969 = vmatpush.bf16.msrb.mxu2 %v2342_v27  ;;  %949 = vmatmul.bf16.gmra.mxu3 %v3066_v35  ;;  %v2199_v27 = vld [vmem:[%s3898_s1 + $0x18] sm:$0xf0] }
  0x3f   : > { %1018 = vmatpush.bf16.msrb.mxu3 %v2406_v28  ;;  %924 = vmatmul.bf16.vlgmr.msra.gmra.mxu1 %v3151_v19  ;;  %v2668_v28 = vld [vmem:[%s2955_s25 + $0xec] sm:$0xf0] }
  0x40   : > { %1067 = vmatpush.bf16.msrb.mxu0 %v2218_v23  ;;  %v2101_v23 = vld [vmem:[%s2955_s25 + $0x48] sm:$0xf] }
  0x42   : > { %970 = vmatpush.bf16.msrb.mxu2 %v2334_v36  ;;  %v2202_v36 = vor.u32 %v2672_v26, %v2199_v27  ;;  %v2103_v26 = vld [vmem:[%s2955_s25 + $0x58] sm:$0xf0] }
  0x43   : > { %1019 = vmatpush.bf16.msrb.mxu3 %v2398_v37  ;;  %v3175_v37 = vor.u32 %v2668_v28, %v2173_v25  ;;  %v2647_v25 = vld [vmem:[%s2955_s25 + $0x4c] sm:$0xf] }
  0x44   : > { %1068 = vmatpush.bf16.msrb.mxu0 %v2210_v24  ;;  %v2649_v24 = vld [vmem:[%s2955_s25 + $0x54] sm:$0xf0]  ;;  %v3269_v28 = vor.u32 %v2647_v25, %v2103_v26 }
  0x45   : > { %v3267_v27 = vor.u32 %v2649_v24, %v2101_v23 }
  0x46   : > { %971 = vmatpush.bf16.msrb.mxu2 %v2326_v41  ;;  %v2191_v41 = vld [vmem:[%s3898_s1 + $0x8] sm:$0xf0] }
  0x47   : > { %1020 = vmatpush.bf16.msrb.mxu3 %v2390_v43  ;;  %v2194_v42 = vor.u32 %v2670_v40, %v2191_v41  ;;  %v2714_v43 = vld [vmem:[%s3898_s1 + $0x164] sm:$0xf]  ;;  %v2700_v40 = vld [vmem:[%s3898_s1 + $0xf4] sm:$0xf]  ;;  %v2311_v41 = vld [vmem:[%s3898_s1 + $0xf8] sm:$0xf0] }
  0x48   : > { %1069 = vmatpush.bf16.msrb.mxu0 %v2202_v36  ;;  %v2370_v46 = vor.u32 %v2714_v43, %v2367_v44  ;;  %v2117_v43 = vld [vmem:[%s2955_s25 + $0x68] sm:$0xf]  ;;  %v2653_v44 = vld [vmem:[%s2955_s25 + $0x74] sm:$0xf0] }
  0x49   : > { %v3296_v47 = vor.u32 %v2653_v44, %v2117_v43 }
  0x4a   : > { %972 = vmatpush.bf16.msrb.mxu2 %v2318_v53  ;;  %v2641_v53 = vld [vmem:[%s2955_s25 + $0x14] sm:$0xf0] }
  0x4b   : > { %1021 = vmatpush.bf16.msrb.mxu3 %v2382_v55  ;;  %v2071_v55 = vld [vmem:[%s2955_s25 + $0x18] sm:$0xf0]  ;;  %v3211_v56 = vor.u32 %v2641_v53, %v2069_v52  ;;  %v2706_v53 = vld [vmem:[%s3898_s1 + $0x124] sm:$0xf] }
  0x4c   : > { %1070 = vmatpush.bf16.msrb.mxu0 %v2194_v42  ;;  %v3213_v57 = vor.u32 %v2639_v54, %v2071_v55  ;;  %v2314_v42 = vor.u32 %v2700_v40, %v2311_v41  ;;  %v2335_v54 = vld [vmem:[%s3898_s1 + $0x128] sm:$0xf0]  ;;  %v2722_v55 = vld [vmem:[%s3898_s1 + $0x1a4] sm:$0xf]  ;;  %v2151_v41 = vld [vmem:[%s2955_s25 + $0xb8] sm:$0xf0] }
  0x4d   : > { %905 = vmatmul.bf16.gmra.mxu2 %v3119_v4  ;;  %885 = vmatmul.bf16.gmra.mxu0 %v3121_v5  ;;  %v2338_v58 = vor.u32 %v2706_v53, %v2335_v54  ;;  %v2659_v40 = vld [vmem:[%s2955_s25 + $0xac] sm:$0xf]  ;;  %v2702_v54 = vld [vmem:[%s3898_s1 + $0x104] sm:$0xf] }
  0x4e   : > { %954 = vmatmul.bf16.gmra.mxu3 %v3123_v6  ;;  %1161 = vmatpush.bf16.msra.mxu2 %v2378_v13  ;;  %v3241_v13 = vor.u32 %v2643_v10, %v2087_v11  ;;  %v3338_v11 = vld [vmem:[%s3899_s2] ss:$8 sm:$0x3] }
  0x4f   : > { %1210 = vmatpush.bf16.msra.mxu3 %v2442_v15  ;;  %929 = vmatmul.bf16.gmra.mxu1 %v3204_v51  ;;  %v2351_v15 = vld [vmem:[%s3898_s1 + $0x148] sm:$0xf0] }
  0x50   : > { %v2354_v17 = vor.u32 %v2710_v14, %v2351_v15  ;;  %1112 = vmatpush.bf16.msrb.mxu1 %v2314_v42  ;;  %v2694_v14 = vld [vmem:[%s3898_s1 + $0xc4] sm:$0xf]  ;;  %v2287_v15 = vld [vmem:[%s3898_s1 + $0xc8] sm:$0xf0] }
  0x52   : > { %1162 = vmatpush.bf16.msra.mxu2 %v2370_v46  ;;  %v2119_v46 = vld [vmem:[%s2955_s25 + $0x78] sm:$0xf0] }
  0x53   : > { %1211 = vmatpush.bf16.msra.mxu3 %v2434_v50  ;;  %v3298_v48 = vor.u32 %v2651_v45, %v2119_v46  ;;  %v2303_v50 = vld [vmem:[%s3898_s1 + $0xe8] sm:$0xf0]  ;;  %v3380_v46 = vor.u32 %v2659_v40, %v2151_v41 }
  0x54   : > { %v2306_v52 = vor.u32 %v2698_v49, %v2303_v50  ;;  %v2690_v50 = vld [vmem:[%s3898_s1 + $0xa4] sm:$0xf] }
  0x56   : > { %1163 = vmatpush.bf16.msra.mxu2 %v2362_v61  ;;  %1113 = vmatpush.bf16.msrb.mxu1 %v2306_v52  ;;  %v2295_v61 = vld [vmem:[%s3898_s1 + $0xd8] sm:$0xf0]  ;;  %v2271_v52 = vld [vmem:[%s3898_s1 + $0xa8] sm:$0xf0] }
  0x57   : > { %v2274_v53 = vor.u32 %v2690_v50, %v2271_v52  ;;  %v2477_v50 = vld [vmem:[%s3900_s3 + $0x40] sm:$0xf]  ;;  %v2743_v52 = vld [vmem:[%s3900_s3 + $0x44] sm:$0xf0] }
  0x5a   : > { %1164 = vmatpush.bf16.msra.mxu2 %v2354_v17  ;;  %v3348_v17 = vperm.slane %v3338_v11, 0 }
  0x5d   : > { %910 = vmatmul.bf16.gmra.mxu2 %v3175_v37  ;;  %890 = vmatmul.bf16.gmra.mxu0 %v3177_v38 }
  0x5e   : > { %959 = vmatmul.bf16.gmra.mxu3 %v3179_v39  ;;  %1165 = vmatpush.bf16.msra.mxu2 %v2346_v34 }
  0x5f   : > { %934 = vmatmul.bf16.gmra.mxu1 %v3232_v7 }
  0x62   : > { %1166 = vmatpush.bf16.msra.mxu2 %v2338_v58  ;;  %v2718_v58 = vld [vmem:[%s3898_s1 + $0x184] sm:$0xf] }
  0x6d   : > { %973 = vmatmul.bf16.vlgmr.msrb.gmra.mxu2 %v3211_v56  ;;  %1071 = vmatmul.bf16.vlgmr.msrb.gmra.mxu0 %v3001_v1  ;;  %v2423_v1 = vld [vmem:[%s3898_s1 + $0x1d8] sm:$0xf0] }
  0x6e   : > { %1022 = vmatmul.bf16.vlgmr.msrb.gmra.mxu3 %v3213_v57  ;;  %v2426_v3 = vor.u32 %v2728_v60, %v2423_v1  ;;  %v2696_v60 = vld [vmem:[%s3898_s1 + $0xd4] sm:$0xf] }
  0x6f   : > { %939 = vmatmul.bf16.gmra.mxu1 %v3260_v22  ;;  %v2298_v1 = vor.u32 %v2696_v60, %v2295_v61  ;;  %v2688_v61 = vld [vmem:[%s3898_s1 + $0x94] sm:$0xf] }
  0x70   : > { %1212 = vmatpush.bf16.msra.mxu3 %v2426_v3  ;;  %v2655_v3 = vld [vmem:[%s2955_s25 + $0x8c] sm:$0xf] }
  0x71   : > { %1114 = vmatpush.bf16.msrb.mxu1 %v2298_v1  ;;  %v3333_v10 = vor.u32 %v2655_v3, %v2135_v8  ;;  %v2263_v1 = vld [vmem:[%s3898_s1 + $0x98] sm:$0xf0] }
  0x72   : > { %v2266_v8 = vor.u32 %v2688_v61, %v2263_v1  ;;  %v2181_v1 = vld [vmem:[%s2955_s25 + $0xe8] sm:$0xf] }
  0x7d   : > { %978 = vmatmul.bf16.gmra.mxu2 %v3239_v12  ;;  %1076 = vmatmul.bf16.gmra.mxu0 %v3058_v32  ;;  %v2415_v32 = vld [vmem:[%s3898_s1 + $0x1c8] sm:$0xf0] }
  0x7e   : > { %1027 = vmatmul.bf16.gmra.mxu3 %v3241_v13  ;;  %v2418_v21 = vor.u32 %v2726_v16, %v2415_v32  ;;  %v2290_v16 = vor.u32 %v2694_v14, %v2287_v15  ;;  %v2704_v32 = vld [vmem:[%s3898_s1 + $0x114] sm:$0xf]  ;;  %v2749_v14 = vld [vmem:[%s3900_s3 + $0x74] sm:$0xf0] }
  0x7f   : > { %v2502_v15 = vor.u32 %v2749_v14, %v2501_v63  ;;  %v2669_v63 = vld [vmem:[%s2955_s25 + $0xf4] sm:$0xf0]  ;;  %v2453_v14 = vld [vmem:[%s3900_s3 + $0x10] sm:$0xf] }
  0x80   : > { %1213 = vmatpush.bf16.msra.mxu3 %v2418_v21  ;;  %1115 = vmatpush.bf16.msrb.mxu1 %v2290_v16  ;;  %v2330_v21 = vor.u32 %v2704_v32, %v2327_v18  ;;  %v2686_v32 = vld [vmem:[%s3898_s1 + $0x84] sm:$0xf]  ;;  %v2255_v18 = vld [vmem:[%s3898_s1 + $0x88] sm:$0xf0] }
  0x81   : > { %1505 = vmatpush.bf16.msra.mxu0 %v2502_v15  ;;  %v2737_v15 = vld [vmem:[%s3900_s3 + $0x14] sm:$0xf0] }
  0x82   : > { %1167 = vmatpush.bf16.msra.mxu2 %v2330_v21  ;;  %v2258_v21 = vor.u32 %v2686_v32, %v2255_v18 }
  0x8d   : > { %983 = vmatmul.bf16.gmra.mxu2 %v3267_v27  ;;  %1081 = vmatmul.bf16.gmra.mxu0 %v3121_v5  ;;  %v2407_v5 = vld [vmem:[%s3898_s1 + $0x1b8] sm:$0xf0] }
  0x8e   : > { %1032 = vmatmul.bf16.gmra.mxu3 %v3269_v28  ;;  %v2410_v36 = vor.u32 %v2724_v33, %v2407_v5  ;;  %v2279_v33 = vld [vmem:[%s3898_s1 + $0xb8] sm:$0xf0]  ;;  %v2149_v5 = vld [vmem:[%s2955_s25 + $0xa8] sm:$0xf] }
  0x8f   : > { %v2282_v34 = vor.u32 %v2692_v30, %v2279_v33  ;;  %v2167_v30 = vld [vmem:[%s2955_s25 + $0xd8] sm:$0xf0] }
  0x90   : > { %1214 = vmatpush.bf16.msra.mxu3 %v2410_v36  ;;  %v2661_v36 = vld [vmem:[%s2955_s25 + $0xb4] sm:$0xf0] }
  0x91   : > { %1116 = vmatpush.bf16.msrb.mxu1 %v2282_v34  ;;  %v3378_v45 = vor.u32 %v2661_v36, %v2149_v5  ;;  %v2485_v34 = vld [vmem:[%s3900_s3 + $0x50] sm:$0xf]  ;;  %v2745_v5 = vld [vmem:[%s3900_s3 + $0x54] sm:$0xf0] }
  0x95   : > { %1117 = vmatpush.bf16.msrb.mxu1 %v2274_v53  ;;  %v2478_v53 = vor.u32 %v2743_v52, %v2477_v50  ;;  %v2764_v52 = vld [vmem:[%s3900_s3 + $0xf4] sm:$0xf] }
  0x99   : > { %1118 = vmatpush.bf16.msrb.mxu1 %v2266_v8 }
  0x9d   : > { %988 = vmatmul.bf16.gmra.mxu2 %v3296_v47  ;;  %1086 = vmatmul.bf16.gmra.mxu0 %v3177_v38  ;;  %v2399_v38 = vld [vmem:[%s3898_s1 + $0x1a8] sm:$0xf0] }
  0x9e   : > { %1037 = vmatmul.bf16.gmra.mxu3 %v3298_v48  ;;  %v2402_v59 = vor.u32 %v2722_v55, %v2399_v38  ;;  %v2319_v55 = vld [vmem:[%s3898_s1 + $0x108] sm:$0xf0]  ;;  %1119 = vmatpush.bf16.msrb.mxu1 %v2258_v21  ;;  %v2454_v21 = vor.u32 %v2737_v15, %v2453_v14 }
  0x9f   : > { %v2322_v38 = vor.u32 %v2702_v54, %v2319_v55  ;;  %v2469_v54 = vld [vmem:[%s3900_s3 + $0x30] sm:$0xf]  ;;  %v2741_v55 = vld [vmem:[%s3900_s3 + $0x34] sm:$0xf0] }
  0xa0   : > { %1215 = vmatpush.bf16.msra.mxu3 %v2402_v59 }
  0xa1   : > { %1168 = vmatpush.bf16.msra.mxu2 %v2322_v38  ;;  %1120 = vmatmul.bf16.vlgmr.msrb.gmra.mxu1 %v3151_v19 }
  0xad   : > { %993 = vmatmul.bf16.gmra.mxu2 %v3331_v9  ;;  %1091 = vmatmul.bf16.gmra.mxu0 %v2993_v62  ;;  %v2391_v62 = vld [vmem:[%s3898_s1 + $0x198] sm:$0xf0] }
  0xae   : > { %1042 = vmatmul.bf16.gmra.mxu3 %v3333_v10  ;;  %v2394_v24 = vor.u32 %v2720_v20, %v2391_v62  ;;  %v2493_v20 = vld [vmem:[%s3900_s3 + $0x60] sm:$0xf]  ;;  %v2747_v62 = vld [vmem:[%s3900_s3 + $0x64] sm:$0xf0] }
  0xb0   : > { %v896_v23 = vpop.f32.mrf.mxu2  ;;  %1216 = vmatpush.bf16.msra.mxu3 %v2394_v24  ;;  %v2165_v24 = vld [vmem:[%s2955_s25 + $0xc8] sm:$0xf] }
  0xb1   : > { %v897_v25 = vadd.f32 %v896_v23, %v3348_v17  ;;  %v945_v26 = vpop.f32.mrf.mxu3  ;;  %v2494_v23 = vor.u32 %v2747_v62, %v2493_v20  ;;  %v3485_v20 = vor.u32 %v2669_v63, %v2181_v1  ;;  %v876_v62 = vpop.f32.mrf.mxu0  ;;  %1125 = vmatmul.bf16.gmra.mxu1 %v3204_v51  ;;  %v2748_v51 = vld [vmem:[%s3900_s3 + $0x74] sm:$0xf] }
  0xb2   : > { %v877_v1 = vadd.f32 %v876_v62, %v3348_v17  ;;  %v2559_v62 = vld [vmem:[%s3900_s3 + $0xe8] sm:$0xf0] }
  0xb3   : > { %v3365_v29 = vadd.f32 %v945_v26, %v897_v25  ;;  %v2665_v25 = vld [vmem:[%s2955_s25 + $0xd4] sm:$0xf0]  ;;  %v2663_v26 = vld [vmem:[%s2955_s25 + $0xcc] sm:$0xf]  ;;  %1506 = vmatpush.bf16.msra.mxu0 %v2494_v23 }
  0xb4   : > { %v3443_v41 = vor.u32 %v2665_v25, %v2165_v24 }
  0xb8   : > { %v898_v42 = vpop.f32.mrf.mxu2 }
  0xb9   : > { %v899_v43 = vadd.f32 %v898_v42, %v3348_v17  ;;  %v947_v44 = vpop.f32.mrf.mxu3  ;;  %v2486_v42 = vor.u32 %v2745_v5, %v2485_v34  ;;  %v2503_v34 = vld [vmem:[%s3900_s3 + $0x78] sm:$0xf0] }
  0xbb   : > { %v3382_v49 = vadd.f32 %v947_v44, %v899_v43  ;;  %v3445_v43 = vor.u32 %v2663_v26, %v2167_v30  ;;  %1507 = vmatpush.bf16.msra.mxu0 %v2486_v42  ;;  %v2445_v26 = vld [vmem:[%s3900_s3] sm:$0xf]  ;;  %v2735_v30 = vld [vmem:[%s3900_s3 + $0x4] sm:$0xf0] }
  0xbc   : > { %v925_v25 = vpop.f32.mrf.mxu1 }
  0xbd   : > { %998 = vmatmul.bf16.gmra.mxu2 %v3378_v45  ;;  %1096 = vmatmul.bf16.gmra.mxu0 %v3056_v31  ;;  %v2383_v31 = vld [vmem:[%s3898_s1 + $0x188] sm:$0xf0] }
  0xbe   : > { %1047 = vmatmul.bf16.gmra.mxu3 %v3380_v46  ;;  %v2386_v60 = vor.u32 %v2718_v58, %v2383_v31 }
  0xbf   : > { %1508 = vmatpush.bf16.msra.mxu0 %v2478_v53  ;;  %v2567_v53 = vld [vmem:[%s3900_s3 + $0xf8] sm:$0xf0] }
  0xc0   : > { %v901_v59 = vpop.f32.mrf.mxu2  ;;  %1217 = vmatpush.bf16.msra.mxu3 %v2386_v60  ;;  %v2739_v60 = vld [vmem:[%s3900_s3 + $0x24] sm:$0xf0] }
  0xc1   : > { %v902_v0 = vadd.f32 %v901_v59, %v3348_v17  ;;  %v950_v3 = vpop.f32.mrf.mxu3  ;;  %v2461_v59 = vld [vmem:[%s3900_s3 + $0x20] sm:$0xf]  ;;  %1130 = vmatmul.bf16.gmra.mxu1 %v3232_v7 }
  0xc2   : > { %v2462_v61 = vor.u32 %v2739_v60, %v2461_v59 }
  0xc3   : > { %v3418_v16 = vadd.f32 %v950_v3, %v902_v0  ;;  %v2667_v0 = vld [vmem:[%s2955_s25 + $0xec] sm:$0xf]  ;;  %v2183_v3 = vld [vmem:[%s2955_s25 + $0xf8] sm:$0xf0] }
  0xc4   : > { %v3487_v23 = vor.u32 %v2667_v0, %v2183_v3  ;;  %v2746_v0 = vld [vmem:[%s3900_s3 + $0x64] sm:$0xf]  ;;  %v2495_v3 = vld [vmem:[%s3900_s3 + $0x68] sm:$0xf0] }
  0xc8   : > { %v903_v33 = vpop.f32.mrf.mxu2 }
  0xc9   : > { %v904_v36 = vadd.f32 %v903_v33, %v3348_v17  ;;  %v952_v40 = vpop.f32.mrf.mxu3  ;;  %v2446_v33 = vor.u32 %v2735_v30, %v2445_v26  ;;  %v2557_v30 = vld [vmem:[%s3900_s3 + $0xe0] sm:$0xf] }
  0xcb   : > { %v3448_v44 = vadd.f32 %v952_v40, %v904_v36  ;;  %v2506_v36 = vor.u32 %v2748_v51, %v2503_v34 }
  0xcd   : > { %1003 = vmatmul.bf16.gmra.mxu2 %v3443_v41  ;;  %1101 = vmatmul.bf16.gmra.mxu0 %v3119_v4  ;;  %v2470_v4 = vor.u32 %v2741_v55, %v2469_v54  ;;  %v927_v54 = vpop.f32.mrf.mxu1  ;;  %v2570_v55 = vor.u32 %v2764_v52, %v2567_v53 }
  0xce   : > { %1052 = vmatmul.bf16.gmra.mxu3 %v3445_v43  ;;  %1603 = vmatpush.bf16.msrb.mxu2 %v2506_v36 }
  0xcf   : > { %1509 = vmatpush.bf16.msra.mxu0 %v2470_v4  ;;  %1652 = vmatpush.bf16.msrb.mxu3 %v2570_v55  ;;  %v2487_v55 = vld [vmem:[%s3900_s3 + $0x58] sm:$0xf0] }
  0xd0   : > { %v906_v19 = vpop.f32.mrf.mxu2 }
  0xd1   : > { %v907_v58 = vadd.f32 %v906_v19, %v3348_v17  ;;  %v955_v38 = vpop.f32.mrf.mxu3  ;;  %v2565_v19 = vld [vmem:[%s3900_s3 + $0xf0] sm:$0xf]  ;;  %1135 = vmatmul.bf16.gmra.mxu1 %v3260_v22 }
  0xd3   : > { %v3466_v31 = vadd.f32 %v955_v38, %v907_v58  ;;  %1510 = vmatpush.bf16.msra.mxu0 %v2462_v61  ;;  %v2765_v58 = vld [vmem:[%s3900_s3 + $0xf4] sm:$0xf0] }
  0xd4   : > { %v2566_v38 = vor.u32 %v2765_v58, %v2565_v19 }
  0xd5   : > { %v930_v7 = vpop.f32.mrf.mxu1 }
  0xd6   : > { %1554 = vmatpush.bf16.msra.mxu1 %v2566_v38 }
  0xd7   : > { %1511 = vmatpush.bf16.msra.mxu0 %v2454_v21 }
  0xd8   : > { %v908_v8 = vpop.f32.mrf.mxu2 }
  0xd9   : > { %v909_v32 = vadd.f32 %v908_v8, %v3348_v17  ;;  %v957_v18 = vpop.f32.mrf.mxu3  ;;  %v2498_v8 = vor.u32 %v2746_v0, %v2495_v3  ;;  %v2760_v0 = vld [vmem:[%s3900_s3 + $0xd4] sm:$0xf]  ;;  %v2551_v3 = vld [vmem:[%s3900_s3 + $0xd8] sm:$0xf0] }
  0xdb   : > { %v3490_v24 = vadd.f32 %v957_v18, %v909_v32  ;;  %1512 = vmatpush.bf16.msra.mxu0 %v2446_v33  ;;  %v926_v32 = vadd.f32 %v925_v25, %v877_v1  ;;  %1604 = vmatpush.bf16.msrb.mxu2 %v2498_v8  ;;  %v2763_v25 = vld [vmem:[%s3900_s3 + $0xe4] sm:$0xf0]  ;;  %v2554_v8 = vor.u32 %v2760_v0, %v2551_v3 }
  0xdc   : > { %v2558_v33 = vor.u32 %v2763_v25, %v2557_v30 }
  0xdd   : > { %1008 = vmatmul.bf16.gmra.mxu2 %v3485_v20  ;;  %1106 = vmatmul.bf16.gmra.mxu0 %v3175_v37  ;;  %v878_v37 = vpop.f32.mrf.mxu0 }
  0xde   : > { %1057 = vmatmul.bf16.gmra.mxu3 %v3487_v23  ;;  %v879_v15 = vadd.f32 %v878_v37, %v3348_v17  ;;  %1555 = vmatpush.bf16.msra.mxu1 %v2558_v33 }
  0xe0   : > { %v911_v5 = vpop.f32.mrf.mxu2  ;;  %v928_v21 = vadd.f32 %v927_v54, %v879_v15  ;;  %v2744_v54 = vld [vmem:[%s3900_s3 + $0x54] sm:$0xf] }
  0xe1   : > { %v912_v40 = vadd.f32 %v911_v5, %v3348_v17  ;;  %v960_v42 = vpop.f32.mrf.mxu3  ;;  %v2490_v22 = vor.u32 %v2744_v54, %v2487_v55  ;;  %1140 = vmatmul.bf16.gmra.mxu1 %v3003_v2  ;;  %v2541_v55 = vld [vmem:[%s3900_s3 + $0xc0] sm:$0xf] }
  0xe3   : > { %v3508_v50 = vadd.f32 %v960_v42, %v912_v40  ;;  %v932_v42 = vpop.f32.mrf.mxu1  ;;  %1605 = vmatpush.bf16.msrb.mxu2 %v2490_v22  ;;  %v2759_v22 = vld [vmem:[%s3900_s3 + $0xc4] sm:$0xf0] }
  0xe5   : > { %v881_v63 = vpop.f32.mrf.mxu0 }
  0xe6   : > { %v882_v52 = vadd.f32 %v881_v63, %v3348_v17 }
  0xe8   : > { %v913_v4 = vpop.f32.mrf.mxu2 }
  0xe9   : > { %v914_v59 = vadd.f32 %v913_v4, %v3348_v17  ;;  %v962_v60 = vpop.f32.mrf.mxu3 }
  0xeb   : > { %v3524_v61 = vadd.f32 %v962_v60, %v914_v59  ;;  %v931_v59 = vadd.f32 %v930_v7, %v882_v52  ;;  %v2761_v7 = vld [vmem:[%s3900_s3 + $0xd4] sm:$0xf0]  ;;  %v2758_v52 = vld [vmem:[%s3900_s3 + $0xc4] sm:$0xf] }
  0xed   : > { %1169 = vmatmul.bf16.vlgmr.msra.gmra.mxu2 %v3211_v56  ;;  %v883_v51 = vpop.f32.mrf.mxu0 }
  0xee   : > { %1218 = vmatmul.bf16.vlgmr.msra.gmra.mxu3 %v3213_v57  ;;  %v2762_v57 = vld [vmem:[%s3900_s3 + $0xe4] sm:$0xf]  ;;  %v884_v4 = vadd.f32 %v883_v51, %v3348_v17 }
  0xef   : > { %v2562_v26 = vor.u32 %v2762_v57, %v2559_v62  ;;  %v2742_v51 = vld [vmem:[%s3900_s3 + $0x44] sm:$0xf] }
  0xf0   : > { %v974_v14 = vpop.f32.mrf.mxu2  ;;  %v933_v63 = vadd.f32 %v932_v42, %v884_v4 }
  0xf1   : > { %v1023_v18 = vpop.f32.mrf.mxu3  ;;  %v975_v56 = vadd.f32 %v974_v14, %v926_v32  ;;  %1653 = vmatpush.bf16.msrb.mxu3 %v2562_v26  ;;  %v2549_v14 = vld [vmem:[%s3900_s3 + $0xd0] sm:$0xf]  ;;  %1145 = vmatmul.bf16.gmra.mxu1 %v3066_v35 }
  0xf2   : > { %v2550_v15 = vor.u32 %v2761_v7, %v2549_v14  ;;  %v2471_v14 = vld [vmem:[%s3900_s3 + $0x38] sm:$0xf0] }
  0xf3   : > { %v1024_v5 = vadd.f32 %v1023_v18, %v975_v56 }
  0xf4   : > { %1556 = vmatpush.bf16.msra.mxu1 %v2550_v15 }
  0xf5   : > { %v1259_v53 = vmax.f32 %v1024_v5, 0.0  ;;  %1654 = vmatpush.bf16.msrb.mxu3 %v2554_v8  ;;  %v2740_v8 = vld [vmem:[%s3900_s3 + $0x34] sm:$0xf] }
  0xf6   : > { %v2474_v35 = vor.u32 %v2740_v8, %v2471_v14  ;;  %v2736_v8 = vld [vmem:[%s3900_s3 + $0x14] sm:$0xf]  ;;  %v2455_v14 = vld [vmem:[%s3900_s3 + $0x18] sm:$0xf0] }
  0xf8   : > { %v976_v34 = vpop.f32.mrf.mxu2 }
  0xf9   : > { %v977_v36 = vadd.f32 %v976_v34, %v928_v21  ;;  %v1025_v40 = vpop.f32.mrf.mxu3  ;;  %v2479_v34 = vld [vmem:[%s3900_s3 + $0x48] sm:$0xf0] }
  0xfa   : > { %v2482_v5 = vor.u32 %v2742_v51, %v2479_v34 }
  0xfb   : > { %v1026_v37 = vadd.f32 %v1025_v40, %v977_v36 }
  0xfc   : > { %1606 = vmatpush.bf16.msrb.mxu2 %v2482_v5 }
  0xfd   : > { %v1261_v19 = vmax.f32 %v1026_v37, 0.0  ;;  %1174 = vmatmul.bf16.gmra.mxu2 %v3239_v12  ;;  %v886_v12 = vpop.f32.mrf.mxu0 }
  0xfe   : > { %1223 = vmatmul.bf16.gmra.mxu3 %v3241_v13  ;;  %v935_v13 = vpop.f32.mrf.mxu1  ;;  %v887_v26 = vadd.f32 %v886_v12, %v3348_v17 }
  0xff   : > { %v3558_v58 = vpack.c.bf16 %v1261_v19, %v1259_v53  ;;  %v2543_v53 = vld [vmem:[%s3900_s3 + $0xc8] sm:$0xf0] }
 0x100   : > { %v979_v38 = vpop.f32.mrf.mxu2  ;;  %v936_v42 = vadd.f32 %v935_v13, %v887_v26  ;;  %v2546_v54 = vor.u32 %v2758_v52, %v2543_v53  ;;  %1607 = vmatpush.bf16.msrb.mxu2 %v2474_v35  ;;  %v2535_v26 = vld [vmem:[%s3900_s3 + $0xb8] sm:$0xf0]  ;;  %v2463_v52 = vld [vmem:[%s3900_s3 + $0x28] sm:$0xf0] }
 0x101   : > { %v1028_v60 = vpop.f32.mrf.mxu3  ;;  %1513 = vmatmul.bf16.vlgmr.msra.gmra.mxu0 %v3558_v58  ;;  %v980_v1 = vadd.f32 %v979_v38, %v931_v59  ;;  %v2542_v38 = vor.u32 %v2759_v22, %v2541_v55  ;;  %1150 = vmatmul.bf16.gmra.mxu1 %v3123_v6  ;;  %v2527_v22 = vld [vmem:[%s3900_s3 + $0xa8] sm:$0xf0] }
 0x102   : > { %1655 = vmatpush.bf16.msrb.mxu3 %v2546_v54 }
 0x103   : > { %v1029_v18 = vadd.f32 %v1028_v60, %v980_v1  ;;  %1557 = vmatpush.bf16.msra.mxu1 %v2542_v38 }
 0x105   : > { %v888_v62 = vpop.f32.mrf.mxu0  ;;  %v1263_v30 = vmax.f32 %v1029_v18, 0.0 }
 0x106   : > { %v937_v33 = vpop.f32.mrf.mxu1  ;;  %v889_v40 = vadd.f32 %v888_v62, %v3348_v17  ;;  %v2756_v62 = vld [vmem:[%s3900_s3 + $0xb4] sm:$0xf] }
 0x108   : > { %v981_v32 = vpop.f32.mrf.mxu2 }
 0x109   : > { %v982_v56 = vadd.f32 %v981_v32, %v933_v63  ;;  %v1030_v21 = vpop.f32.mrf.mxu3 }
 0x10b   : > { %v1031_v57 = vadd.f32 %v1030_v21, %v982_v56 }
 0x10d   : > { %v1265_v25 = vmax.f32 %v1031_v57, 0.0  ;;  %1179 = vmatmul.bf16.gmra.mxu2 %v3267_v27  ;;  %v891_v19 = vpop.f32.mrf.mxu0 }
 0x10e   : > { %1228 = vmatmul.bf16.gmra.mxu3 %v3269_v28  ;;  %v938_v28 = vadd.f32 %v937_v33, %v889_v40  ;;  %v940_v59 = vpop.f32.mrf.mxu1  ;;  %v892_v63 = vadd.f32 %v891_v19, %v3348_v17 }
 0x10f   : > { %v3584_v2 = vpack.c.bf16 %v1265_v25, %v1263_v30  ;;  %v2538_v30 = vor.u32 %v2756_v62, %v2535_v26  ;;  %v2757_v25 = vld [vmem:[%s3900_s3 + $0xb4] sm:$0xf0]  ;;  %v2447_v62 = vld [vmem:[%s3900_s3 + $0x8] sm:$0xf0] }
 0x110   : > { %v984_v36 = vpop.f32.mrf.mxu2  ;;  %v941_v56 = vadd.f32 %v940_v59, %v892_v63  ;;  %v2755_v59 = vld [vmem:[%s3900_s3 + $0xa4] sm:$0xf0] }
 0x111   : > { %v1033_v37 = vpop.f32.mrf.mxu3  ;;  %1518 = vmatmul.bf16.gmra.mxu0 %v3584_v2  ;;  %v985_v27 = vadd.f32 %v984_v36, %v936_v42  ;;  %1656 = vmatpush.bf16.msrb.mxu3 %v2538_v30 }
 0x112   : > { %1155 = vmatmul.bf16.gmra.mxu1 %v3179_v39  ;;  %v2458_v39 = vor.u32 %v2736_v8, %v2455_v14  ;;  %v3724_v8 = vperm.slane %v3338_v11, 1 }
 0x113   : > { %v1034_v60 = vadd.f32 %v1033_v37, %v985_v27 }
 0x115   : > { %v1267_v0 = vmax.f32 %v1034_v60, 0.0  ;;  %v893_v15 = vpop.f32.mrf.mxu0 }
 0x116   : > { %v894_v18 = vadd.f32 %v893_v15, %v3348_v17  ;;  %v2533_v17 = vld [vmem:[%s3900_s3 + $0xb0] sm:$0xf] }
 0x117   : > { %v2534_v33 = vor.u32 %v2757_v25, %v2533_v17 }
 0x118   : > { %v986_v4 = vpop.f32.mrf.mxu2 }
 0x119   : > { %v987_v12 = vadd.f32 %v986_v4, %v938_v28  ;;  %v1035_v13 = vpop.f32.mrf.mxu3  ;;  %1558 = vmatpush.bf16.msra.mxu1 %v2534_v33  ;;  %v2738_v28 = vld [vmem:[%s3900_s3 + $0x24] sm:$0xf]  ;;  %v2525_v4 = vld [vmem:[%s3900_s3 + $0xa0] sm:$0xf] }
 0x11a   : > { %v2466_v6 = vor.u32 %v2738_v28, %v2463_v52  ;;  %v2526_v60 = vor.u32 %v2755_v59, %v2525_v4  ;;  %v2750_v52 = vld [vmem:[%s3900_s3 + $0x84] sm:$0xf] }
 0x11b   : > { %v1036_v1 = vadd.f32 %v1035_v13, %v987_v12 }
 0x11c   : > { %1608 = vmatpush.bf16.msrb.mxu2 %v2466_v6  ;;  %v2509_v6 = vld [vmem:[%s3900_s3 + $0x80] sm:$0xf] }
 0x11d   : > { %v1269_v3 = vmax.f32 %v1036_v1, 0.0  ;;  %1184 = vmatmul.bf16.gmra.mxu2 %v3296_v47  ;;  %v942_v47 = vpop.f32.mrf.mxu1  ;;  %v3627_v40 = vpop.f32.mrf.mxu0  ;;  %1559 = vmatpush.bf16.msra.mxu1 %v2526_v60 }
 0x11e   : > { %1233 = vmatmul.bf16.gmra.mxu3 %v3298_v48  ;;  %v943_v57 = vadd.f32 %v942_v47, %v894_v18  ;;  %v2519_v18 = vld [vmem:[%s3900_s3 + $0x98] sm:$0xf0]  ;;  %v2753_v47 = vld [vmem:[%s3900_s3 + $0x94] sm:$0xf0] }
 0x11f   : > { %v3610_v7 = vpack.c.bf16 %v1269_v3, %v1267_v0 }
 0x120   : > { %v989_v32 = vpop.f32.mrf.mxu2  ;;  %1609 = vmatpush.bf16.msrb.mxu2 %v2458_v39 }
 0x121   : > { %v1038_v21 = vpop.f32.mrf.mxu3  ;;  %1523 = vmatmul.bf16.gmra.mxu0 %v3610_v7  ;;  %v990_v48 = vadd.f32 %v989_v32, %v941_v56 }
 0x123   : > { %v1039_v34 = vadd.f32 %v1038_v21, %v990_v48  ;;  %v2517_v21 = vld [vmem:[%s3900_s3 + $0x90] sm:$0xf] }
 0x124   : > { %v2518_v48 = vor.u32 %v2753_v47, %v2517_v21 }
 0x125   : > { %v1271_v37 = vmax.f32 %v1039_v34, 0.0  ;;  %v3640_v55 = vpop.f32.mrf.mxu0 }
 0x126   : > { %1560 = vmatpush.bf16.msra.mxu1 %v2518_v48 }
 0x128   : > { %v991_v51 = vpop.f32.mrf.mxu2 }
 0x129   : > { %v992_v5 = vadd.f32 %v991_v51, %v943_v57  ;;  %v1040_v36 = vpop.f32.mrf.mxu3 }
 0x12b   : > { %v1041_v42 = vadd.f32 %v1040_v36, %v992_v5  ;;  %v1121_v36 = vpop.f32.mrf.mxu1 }
 0x12d   : > { %v1273_v27 = vmax.f32 %v1041_v42, 0.0  ;;  %1189 = vmatmul.bf16.gmra.mxu2 %v3331_v9 }
 0x12e   : > { %1238 = vmatmul.bf16.gmra.mxu3 %v3333_v10  ;;  %v2754_v10 = vld [vmem:[%s3900_s3 + $0xa4] sm:$0xf] }
 0x12f   : > { %v3637_v53 = vpack.c.bf16 %v1273_v27, %v1271_v37  ;;  %v2530_v38 = vor.u32 %v2754_v10, %v2527_v22 }
 0x130   : > { %v994_v19 = vpop.f32.mrf.mxu2 }
 0x131   : > { %v1043_v54 = vpop.f32.mrf.mxu3  ;;  %1528 = vmatmul.bf16.gmra.mxu0 %v3637_v53  ;;  %v995_v9 = vadd.f32 %v994_v19, %v3365_v29  ;;  %1657 = vmatpush.bf16.msrb.mxu3 %v2530_v38  ;;  %v2751_v19 = vld [vmem:[%s3900_s3 + $0x84] sm:$0xf0] }
 0x133   : > { %v1044_v29 = vadd.f32 %v1043_v54, %v995_v9  ;;  %v2510_v54 = vor.u32 %v2751_v19, %v2509_v6 }
 0x135   : > { %v1275_v0 = vmax.f32 %v1044_v29, 0.0  ;;  %1561 = vmatpush.bf16.msra.mxu1 %v2510_v54 }
 0x138   : > { %v996_v12 = vpop.f32.mrf.mxu2 }
 0x139   : > { %v997_v13 = vadd.f32 %v996_v12, %v3382_v49  ;;  %v1045_v1 = vpop.f32.mrf.mxu3  ;;  %v3665_v49 = vpop.f32.mrf.mxu0 }
 0x13b   : > { %v1046_v63 = vadd.f32 %v1045_v1, %v997_v13 }
 0x13d   : > { %v1277_v3 = vmax.f32 %v1046_v63, 0.0  ;;  %1194 = vmatmul.bf16.gmra.mxu2 %v3378_v45 }
 0x13e   : > { %1243 = vmatmul.bf16.gmra.mxu3 %v3380_v46  ;;  %v2752_v46 = vld [vmem:[%s3900_s3 + $0x94] sm:$0xf] }
 0x13f   : > { %v3667_v35 = vpack.c.bf16 %v1277_v3, %v1275_v0  ;;  %v2522_v56 = vor.u32 %v2752_v46, %v2519_v18 }
 0x140   : > { %v999_v15 = vpop.f32.mrf.mxu2 }
 0x141   : > { %v1048_v32 = vpop.f32.mrf.mxu3  ;;  %1533 = vmatmul.bf16.gmra.mxu0 %v3667_v35  ;;  %v1000_v45 = vadd.f32 %v999_v15, %v3418_v16  ;;  %1658 = vmatpush.bf16.msrb.mxu3 %v2522_v56  ;;  %v2734_v16 = vld [vmem:[%s3900_s3 + $0x4] sm:$0xf]  ;;  %v3689_v26 = vpop.f32.mrf.mxu0 }
 0x142   : > { %v2450_v33 = vor.u32 %v2734_v16, %v2447_v62 }
 0x143   : > { %v1049_v30 = vadd.f32 %v1048_v32, %v1000_v45  ;;  %v1073_v32 = vadd.f32 %v3627_v40, %v3724_v8  ;;  %v2773_v40 = vld [vmem:[%s3902_s5 + $0x38] sm:$0xff] }
 0x144   : > { %1610 = vmatpush.bf16.msrb.mxu2 %v2450_v33  ;;  %1879 = vmatpush.bf16.msrb.mxu0 %v2773_v40 }
 0x145   : > { %v1279_v34 = vmax.f32 %v1049_v30, 0.0  ;;  %v1122_v11 = vadd.f32 %v1121_v36, %v1073_v32 }
 0x148   : > { %v1001_v57 = vpop.f32.mrf.mxu2 }
 0x149   : > { %v1002_v17 = vadd.f32 %v1001_v57, %v3448_v44  ;;  %v1050_v25 = vpop.f32.mrf.mxu3  ;;  %v3697_v28 = vpop.f32.mrf.mxu0 }
 0x14b   : > { %v1051_v51 = vadd.f32 %v1050_v25, %v1002_v17 }
 0x14d   : > { %v1281_v5 = vmax.f32 %v1051_v51, 0.0  ;;  %1199 = vmatmul.bf16.gmra.mxu2 %v3443_v41  ;;  %v2511_v41 = vld [vmem:[%s3900_s3 + $0x88] sm:$0xf0] }
 0x14e   : > { %1248 = vmatmul.bf16.gmra.mxu3 %v3445_v43  ;;  %v2514_v43 = vor.u32 %v2750_v52, %v2511_v41  ;;  %v2772_v41 = vld [vmem:[%s3902_s5 + $0x30] sm:$0xff] }
 0x14f   : > { %v3694_v42 = vpack.c.bf16 %v1281_v5, %v1279_v34  ;;  %1880 = vmatpush.bf16.msrb.mxu0 %v2772_v41 }
 0x150   : > { %v1004_v37 = vpop.f32.mrf.mxu2  ;;  %1659 = vmatpush.bf16.msrb.mxu3 %v2514_v43 }
 0x151   : > { %v1053_v27 = vpop.f32.mrf.mxu3  ;;  %1538 = vmatmul.bf16.gmra.mxu0 %v3694_v42  ;;  %v1005_v44 = vadd.f32 %v1004_v37, %v3466_v31  ;;  %v1123_v31 = vpop.f32.mrf.mxu1 }
 0x152   : > { %v3713_v59 = vpop.f32.mrf.mxu0 }
 0x153   : > { %v1054_v10 = vadd.f32 %v1053_v27, %v1005_v44  ;;  %v1080_v44 = vadd.f32 %v3689_v26, %v3724_v8  ;;  %v1083_v26 = vadd.f32 %v3697_v28, %v3724_v8  ;;  %v2779_v28 = vld [vmem:[%s3902_s5 + $0x68] sm:$0xff] }
 0x155   : > { %v1283_v60 = vmax.f32 %v1054_v10, 0.0 }
 0x158   : > { %v1006_v9 = vpop.f32.mrf.mxu2 }
 0x159   : > { %v1007_v22 = vadd.f32 %v1006_v9, %v3490_v24  ;;  %v1055_v38 = vpop.f32.mrf.mxu3  ;;  %v1126_v63 = vpop.f32.mrf.mxu1 }
 0x15a   : > { %v3721_v0 = vpop.f32.mrf.mxu0 }
 0x15b   : > { %v1056_v4 = vadd.f32 %v1055_v38, %v1007_v22 }
 0x15d   : > { %v1285_v12 = vmax.f32 %v1056_v4, 0.0  ;;  %1204 = vmatmul.bf16.gmra.mxu2 %v3485_v20 }
 0x15e   : > { %1253 = vmatmul.bf16.gmra.mxu3 %v3487_v23 }
 0x15f   : > { %v3717_v29 = vpack.c.bf16 %v1285_v12, %v1283_v60 }
 0x160   : > { %v1009_v13 = vpop.f32.mrf.mxu2 }
 0x161   : > { %v1058_v1 = vpop.f32.mrf.mxu3  ;;  %1543 = vmatmul.bf16.gmra.mxu0 %v3717_v29  ;;  %v1010_v24 = vadd.f32 %v1009_v13, %v3508_v50  ;;  %v1128_v15 = vpop.f32.mrf.mxu1 }
 0x162   : > { %v3732_v56 = vpop.f32.mrf.mxu0 }
 0x163   : > { %v1059_v14 = vadd.f32 %v1058_v1, %v1010_v24  ;;  %v1085_v1 = vadd.f32 %v3713_v59, %v3724_v8  ;;  %v1088_v59 = vadd.f32 %v3721_v0, %v3724_v8  ;;  %v2770_v0 = vld [vmem:[%s3902_s5 + $0x20] sm:$0xff] }
 0x165   : > { %v1287_v45 = vmax.f32 %v1059_v14, 0.0 }
 0x168   : > { %v1011_v3 = vpop.f32.mrf.mxu2 }
 0x169   : > { %v1012_v20 = vadd.f32 %v1011_v3, %v3524_v61  ;;  %v1060_v39 = vpop.f32.mrf.mxu3  ;;  %v1075_v61 = vadd.f32 %v3640_v55, %v3724_v8  ;;  %v1131_v48 = vpop.f32.mrf.mxu1  ;;  %v1078_v55 = vadd.f32 %v3665_v49, %v3724_v8  ;;  %v2780_v49 = vld [vmem:[%s3902_s5 + $0x70] sm:$0xff]  ;;  %v2771_v3 = vld [vmem:[%s3902_s5 + $0x28] sm:$0xff] }
 0x16a   : > { %v1092_v10 = vpop.f32.mrf.mxu0  ;;  %v1132_v12 = vadd.f32 %v1131_v48, %v1083_v26  ;;  %1881 = vmatpush.bf16.msrb.mxu0 %v2771_v3  ;;  %v2768_v3 = vld [vmem:[%s3902_s5 + $0x10] sm:$0xff] }
 0x16b   : > { %v1061_v23 = vadd.f32 %v1060_v39, %v1012_v20  ;;  %v1124_v57 = vadd.f32 %v1123_v31, %v1075_v61  ;;  %v1127_v37 = vadd.f32 %v1126_v63, %v1078_v55 }
 0x16d   : > { %v1289_v46 = vmax.f32 %v1061_v23, 0.0  ;;  %1611 = vmatmul.bf16.vlgmr.msrb.gmra.mxu2 %v3558_v58  ;;  %v2781_v58 = vld [vmem:[%s3902_s5 + $0x78] sm:$0xff] }
 0x16e   : > { %1928 = vmatpush.bf16.msrb.mxu1 %v2781_v58  ;;  %v1090_v58 = vadd.f32 %v3732_v56, %v3724_v8  ;;  %1882 = vmatpush.bf16.msrb.mxu0 %v2770_v0  ;;  %v1093_v56 = vadd.f32 %v1092_v10, %v3724_v8 }
 0x16f   : > { %v3730_v50 = vpack.c.bf16 %v1289_v46, %v1287_v45 }
 0x170   : > { %v1170_v18 = vpop.f32.mrf.mxu2 }
 0x171   : > { %v1219_v21 = vpop.f32.mrf.mxu3  ;;  %1548 = vmatmul.bf16.gmra.mxu0 %v3730_v50  ;;  %v1171_v47 = vadd.f32 %v1170_v18, %v1122_v11  ;;  %v1133_v36 = vpop.f32.mrf.mxu1 }
 0x172   : > { %1929 = vmatpush.bf16.msrb.mxu1 %v2780_v49  ;;  %v1134_v14 = vadd.f32 %v1133_v36, %v1085_v1 }
 0x173   : > { %v1220_v62 = vadd.f32 %v1219_v21, %v1171_v47 }
 0x175   : > { %v1260_v33 = vmax.f32 %v1220_v62, 0.0 }
 0x176   : > { %1930 = vmatpush.bf16.msrb.mxu1 %v2779_v28  ;;  %v2776_v28 = vld [vmem:[%s3902_s5 + $0x50] sm:$0xff] }
 0x178   : > { %v1172_v16 = vpop.f32.mrf.mxu2 }
 0x179   : > { %v1173_v30 = vadd.f32 %v1172_v16, %v1124_v57  ;;  %v1221_v17 = vpop.f32.mrf.mxu3  ;;  %v1136_v9 = vpop.f32.mrf.mxu1 }
 0x17a   : > { %v1137_v47 = vadd.f32 %v1136_v9, %v1088_v59 }
 0x17b   : > { %v1222_v25 = vadd.f32 %v1221_v17, %v1173_v30 }
 0x17d   : > { %v1262_v51 = vmax.f32 %v1222_v25, 0.0  ;;  %1616 = vmatmul.bf16.gmra.mxu2 %v3584_v2  ;;  %v1129_v2 = vadd.f32 %v1128_v15, %v1080_v44 }
 0x17f   : > { %v1292_v34 = vpack.c.bf16 %v1262_v51, %v1260_v33 }
 0x180   : > { %v1175_v5 = vpop.f32.mrf.mxu2 }
 0x181   : > { %v1224_v27 = vpop.f32.mrf.mxu3  ;;  %1562 = vmatmul.bf16.vlgmr.msra.gmra.mxu1 %v1292_v34  ;;  %1660 = vmatmul.bf16.vlgmr.msrb.gmra.mxu3 %v1292_v34  ;;  %v1176_v52 = vadd.f32 %v1175_v5, %v1127_v37  ;;  %v1138_v63 = vpop.f32.mrf.mxu1 }
 0x182   : > { %v1139_v57 = vadd.f32 %v1138_v63, %v1090_v58  ;;  %v2775_v58 = vld [vmem:[%s3902_s5 + $0x48] sm:$0xff] }
 0x183   : > { %v1225_v6 = vadd.f32 %v1224_v27, %v1176_v52 }
 0x185   : > { %v1264_v22 = vmax.f32 %v1225_v6, 0.0 }
 0x188   : > { %v1177_v43 = vpop.f32.mrf.mxu2 }
 0x189   : > { %v1178_v19 = vadd.f32 %v1177_v43, %v1129_v2  ;;  %v1226_v54 = vpop.f32.mrf.mxu3  ;;  %v1141_v18 = vpop.f32.mrf.mxu1  ;;  %v2769_v2 = vld [vmem:[%s3902_s5 + $0x18] sm:$0xff] }
 0x18a   : > { %v1142_v37 = vadd.f32 %v1141_v18, %v1093_v56  ;;  %v2777_v43 = vld [vmem:[%s3902_s5 + $0x58] sm:$0xff]  ;;  %1883 = vmatpush.bf16.msrb.mxu0 %v2769_v2 }
 0x18b   : > { %v1227_v31 = vadd.f32 %v1226_v54, %v1178_v19 }
 0x18d   : > { %v1266_v38 = vmax.f32 %v1227_v31, 0.0  ;;  %1621 = vmatmul.bf16.gmra.mxu2 %v3610_v7  ;;  %v1094_v7 = vpop.f32.mrf.mxu0 }
 0x18e   : > { %v1095_v52 = vadd.f32 %v1094_v7, %v3724_v8  ;;  %1884 = vmatpush.bf16.msrb.mxu0 %v2768_v3 }
 0x18f   : > { %v1294_v4 = vpack.c.bf16 %v1266_v38, %v1264_v22 }
 0x190   : > { %v1180_v60 = vpop.f32.mrf.mxu2 }
 0x191   : > { %v1229_v13 = vpop.f32.mrf.mxu3  ;;  %1567 = vmatmul.bf16.gmra.mxu1 %v1294_v4  ;;  %1665 = vmatmul.bf16.gmra.mxu3 %v1294_v4  ;;  %v1181_v24 = vadd.f32 %v1180_v60, %v1132_v12  ;;  %v1143_v62 = vpop.f32.mrf.mxu1 }
 0x193   : > { %v1230_v39 = vadd.f32 %v1229_v13, %v1181_v24 }
 0x195   : > { %v1268_v45 = vmax.f32 %v1230_v39, 0.0  ;;  %v1097_v21 = vpop.f32.mrf.mxu0 }
 0x196   : > { %v1098_v26 = vadd.f32 %v1097_v21, %v3724_v8 }
 0x198   : > { %v1182_v20 = vpop.f32.mrf.mxu2 }
 0x199   : > { %v1183_v23 = vadd.f32 %v1182_v20, %v1134_v14  ;;  %v1231_v15 = vpop.f32.mrf.mxu3  ;;  %v1146_v44 = vpop.f32.mrf.mxu1 }
 0x19a   : > { %v1147_v13 = vadd.f32 %v1146_v44, %v1098_v26  ;;  %v2774_v44 = vld [vmem:[%s3902_s5 + $0x40] sm:$0xff] }
 0x19b   : > { %v1232_v32 = vadd.f32 %v1231_v15, %v1183_v23 }
 0x19d   : > { %v1270_v46 = vmax.f32 %v1232_v32, 0.0  ;;  %1626 = vmatmul.bf16.gmra.mxu2 %v3637_v53  ;;  %v2778_v53 = vld [vmem:[%s3902_s5 + $0x60] sm:$0xff]  ;;  %v1099_v55 = vpop.f32.mrf.mxu0 }
 0x19e   : > { %1931 = vmatpush.bf16.msrb.mxu1 %v2778_v53  ;;  %v1100_v63 = vadd.f32 %v1099_v55, %v3724_v8 }
 0x19f   : > { %v1296_v11 = vpack.c.bf16 %v1270_v46, %v1268_v45 }
 0x1a0   : > { %v1185_v61 = vpop.f32.mrf.mxu2 }
 0x1a1   : > { %v1234_v40 = vpop.f32.mrf.mxu3  ;;  %1572 = vmatmul.bf16.gmra.mxu1 %v1296_v11  ;;  %1670 = vmatmul.bf16.gmra.mxu3 %v1296_v11  ;;  %v1186_v48 = vadd.f32 %v1185_v61, %v1137_v47  ;;  %v1148_v10 = vpop.f32.mrf.mxu1 }
 0x1a2   : > { %1932 = vmatpush.bf16.msrb.mxu1 %v2777_v43 }
 0x1a3   : > { %v1235_v30 = vadd.f32 %v1234_v40, %v1186_v48  ;;  %v2767_v40 = vld [vmem:[%s3902_s5 + $0x8] sm:$0xff] }
 0x1a4   : > { %1885 = vmatpush.bf16.msrb.mxu0 %v2767_v40 }
 0x1a5   : > { %v1272_v51 = vmax.f32 %v1235_v30, 0.0  ;;  %v1102_v41 = vpop.f32.mrf.mxu0 }
 0x1a6   : > { %1933 = vmatpush.bf16.msrb.mxu1 %v2776_v28  ;;  %v1103_v59 = vadd.f32 %v1102_v41, %v3724_v8 }
 0x1a8   : > { %v1187_v16 = vpop.f32.mrf.mxu2 }
 0x1a9   : > { %v1188_v17 = vadd.f32 %v1187_v16, %v1139_v57  ;;  %v1236_v25 = vpop.f32.mrf.mxu3  ;;  %v1151_v7 = vpop.f32.mrf.mxu1 }
 0x1aa   : > { %v1152_v61 = vadd.f32 %v1151_v7, %v1103_v59  ;;  %1934 = vmatpush.bf16.msrb.mxu1 %v2775_v58 }
 0x1ab   : > { %v1237_v33 = vadd.f32 %v1236_v25, %v1188_v17 }
 0x1ad   : > { %v1274_v34 = vmax.f32 %v1237_v33, 0.0  ;;  %1631 = vmatmul.bf16.gmra.mxu2 %v3667_v35  ;;  %v1144_v35 = vadd.f32 %v1143_v62, %v1095_v52  ;;  %v1104_v4 = vpop.f32.mrf.mxu0 }
 0x1ae   : > { %v1105_v0 = vadd.f32 %v1104_v4, %v3724_v8  ;;  %1935 = vmatpush.bf16.msrb.mxu1 %v2774_v44  ;;  %v1339_v4 = vld [vmem:[%s3901_s4] ss:$8 sm:$0x3] }
 0x1af   : > { %v1298_v5 = vpack.c.bf16 %v1274_v34, %v1272_v51  ;;  %v3819_v28 = vperm.slane %v1339_v4, 1 }
 0x1b0   : > { %v1190_v36 = vpop.f32.mrf.mxu2 }
 0x1b1   : > { %v1239_v27 = vpop.f32.mrf.mxu3  ;;  %1577 = vmatmul.bf16.gmra.mxu1 %v1298_v5  ;;  %1675 = vmatmul.bf16.gmra.mxu3 %v1298_v5  ;;  %v1191_v49 = vadd.f32 %v1190_v36, %v1142_v37  ;;  %v1153_v11 = vpop.f32.mrf.mxu1 }
 0x1b2   : > { %v1154_v53 = vadd.f32 %v1153_v11, %v1105_v0 }
 0x1b3   : > { %v1240_v19 = vadd.f32 %v1239_v27, %v1191_v49  ;;  %v2766_v27 = vld [vmem:[%s3902_s5] sm:$0xff] }
 0x1b4   : > { %1886 = vmatpush.bf16.msrb.mxu0 %v2766_v27 }
 0x1b5   : > { %v1276_v22 = vmax.f32 %v1240_v19, 0.0  ;;  %v1107_v14 = vpop.f32.mrf.mxu0 }
 0x1b6   : > { %v1108_v33 = vadd.f32 %v1107_v14, %v3724_v8 }
 0x1b8   : > { %v1192_v6 = vpop.f32.mrf.mxu2 }
 0x1b9   : > { %v1193_v54 = vadd.f32 %v1192_v6, %v1144_v35  ;;  %v1241_v9 = vpop.f32.mrf.mxu3  ;;  %v1156_v17 = vpop.f32.mrf.mxu1 }
 0x1ba   : > { %v1157_v36 = vadd.f32 %v1156_v17, %v1108_v33 }
 0x1bb   : > { %v1242_v31 = vadd.f32 %v1241_v9, %v1193_v54 }
 0x1bd   : > { %v1278_v38 = vmax.f32 %v1242_v31, 0.0  ;;  %1636 = vmatmul.bf16.gmra.mxu2 %v3694_v42  ;;  %v1149_v42 = vadd.f32 %v1148_v10, %v1100_v63  ;;  %v1109_v48 = vpop.f32.mrf.mxu0 }
 0x1be   : > { %v1110_v52 = vadd.f32 %v1109_v48, %v3724_v8 }
 0x1bf   : > { %v1300_v60 = vpack.c.bf16 %v1278_v38, %v1276_v22 }
 0x1c0   : > { %v1195_v12 = vpop.f32.mrf.mxu2 }
 0x1c1   : > { %v1244_v1 = vpop.f32.mrf.mxu3  ;;  %1582 = vmatmul.bf16.gmra.mxu1 %v1300_v60  ;;  %1680 = vmatmul.bf16.gmra.mxu3 %v1300_v60  ;;  %v1196_v24 = vadd.f32 %v1195_v12, %v1147_v13  ;;  %v1158_v41 = vpop.f32.mrf.mxu1  ;;  %v3815_v12 = vperm.slane %v1339_v4, 0 }
 0x1c2   : > { %v1159_v2 = vadd.f32 %v1158_v41, %v1110_v52 }
 0x1c3   : > { %v1245_v39 = vadd.f32 %v1244_v1, %v1196_v24 }
 0x1c5   : > { %v1280_v45 = vmax.f32 %v1245_v39, 0.0  ;;  %v1514_v55 = vpop.f32.mrf.mxu0 }
 0x1c6   : > { %v1515_v1 = vadd.f32 %v1514_v55, %v3815_v12 }
 0x1c8   : > { %v1197_v20 = vpop.f32.mrf.mxu2 }
 0x1c9   : > { %v1198_v23 = vadd.f32 %v1197_v20, %v1149_v42  ;;  %v1246_v15 = vpop.f32.mrf.mxu3 }
 0x1cb   : > { %v1247_v32 = vadd.f32 %v1246_v15, %v1198_v23 }
 0x1cd   : > { %v1282_v46 = vmax.f32 %v1247_v32, 0.0  ;;  %1641 = vmatmul.bf16.gmra.mxu2 %v3717_v29  ;;  %v1516_v49 = vpop.f32.mrf.mxu0 }
 0x1ce   : > { %v1517_v3 = vadd.f32 %v1516_v49, %v3815_v12 }
 0x1cf   : > { %v1302_v18 = vpack.c.bf16 %v1282_v46, %v1280_v45 }
 0x1d0   : > { %v1200_v21 = vpop.f32.mrf.mxu2 }
 0x1d1   : > { %v1249_v47 = vpop.f32.mrf.mxu3  ;;  %1587 = vmatmul.bf16.gmra.mxu1 %v1302_v18  ;;  %1685 = vmatmul.bf16.gmra.mxu3 %v1302_v18  ;;  %v1201_v29 = vadd.f32 %v1200_v21, %v1152_v61 }
 0x1d3   : > { %v1250_v16 = vadd.f32 %v1249_v47, %v1201_v29 }
 0x1d5   : > { %v1284_v56 = vmax.f32 %v1250_v16, 0.0  ;;  %v1519_v26 = vpop.f32.mrf.mxu0 }
 0x1d6   : > { %v1520_v48 = vadd.f32 %v1519_v26, %v3815_v12 }
 0x1d8   : > { %v1202_v57 = vpop.f32.mrf.mxu2 }
 0x1d9   : > { %v1203_v62 = vadd.f32 %v1202_v57, %v1154_v53  ;;  %v1251_v30 = vpop.f32.mrf.mxu3 }
 0x1db   : > { %v1252_v25 = vadd.f32 %v1251_v30, %v1203_v62 }
 0x1dd   : > { %v1286_v51 = vmax.f32 %v1252_v25, 0.0  ;;  %1646 = vmatmul.bf16.gmra.mxu2 %v3730_v50  ;;  %v1521_v8 = vpop.f32.mrf.mxu0 }
 0x1de   : > { %v1522_v29 = vadd.f32 %v1521_v8, %v3815_v12 }
 0x1df   : > { %v1304_v34 = vpack.c.bf16 %v1286_v51, %v1284_v56 }
 0x1e0   : > { %v1205_v5 = vpop.f32.mrf.mxu2 }
 0x1e1   : > { %v1254_v37 = vpop.f32.mrf.mxu3  ;;  %1592 = vmatmul.bf16.gmra.mxu1 %v1304_v34  ;;  %1690 = vmatmul.bf16.gmra.mxu3 %v1304_v34  ;;  %v1206_v50 = vadd.f32 %v1205_v5, %v1157_v36 }
 0x1e3   : > { %v1255_v35 = vadd.f32 %v1254_v37, %v1206_v50 }
 0x1e5   : > { %v1288_v9 = vmax.f32 %v1255_v35, 0.0  ;;  %v1524_v63 = vpop.f32.mrf.mxu0 }
 0x1e6   : > { %v1525_v50 = vadd.f32 %v1524_v63, %v3815_v12 }
 0x1e8   : > { %v1207_v43 = vpop.f32.mrf.mxu2 }
 0x1e9   : > { %v1208_v6 = vadd.f32 %v1207_v43, %v1159_v2  ;;  %v1256_v19 = vpop.f32.mrf.mxu3 }
 0x1eb   : > { %v1257_v54 = vadd.f32 %v1256_v19, %v1208_v6 }
 0x1ed   : > { %v1290_v31 = vmax.f32 %v1257_v54, 0.0  ;;  %v1526_v11 = vpop.f32.mrf.mxu0 }
 0x1ee   : > { %v1527_v2 = vadd.f32 %v1526_v11, %v3815_v12 }
 0x1ef   : > { %v1306_v10 = vpack.c.bf16 %v1290_v31, %v1288_v9 }
 0x1f0   : > { %v1612_v22 = vpop.f32.mrf.mxu2 }
 0x1f1   : > { %1597 = vmatmul.bf16.gmra.mxu1 %v1306_v10  ;;  %1695 = vmatmul.bf16.gmra.mxu3 %v1306_v10  ;;  %v1613_v39 = vadd.f32 %v1612_v22, %v3819_v28 }
 0x1f5   : > { %v1529_v62 = vpop.f32.mrf.mxu0 }
 0x1f8   : > { %v1614_v38 = vpop.f32.mrf.mxu2 }
 0x1f9   : > { %v1615_v32 = vadd.f32 %v1614_v38, %v3819_v28 }
 0x1fd   : > { %v1531_v41 = vpop.f32.mrf.mxu0 }
 0x1fe   : > { %v1563_v60 = vpop.f32.mrf.mxu1 }
 0x1ff   : > { %v1564_v7 = vadd.f32 %v1563_v60, %v1515_v1 }
 0x200   : > { %v1617_v13 = vpop.f32.mrf.mxu2 }
 0x201   : > { %v1701_v23 = vmax.f32 %v1564_v7, 0.0  ;;  %v1618_v17 = vadd.f32 %v1617_v13, %v3819_v28 }
 0x204   : > { %v1661_v24 = vpop.f32.mrf.mxu3 }
 0x205   : > { %v1662_v59 = vadd.f32 %v1661_v24, %v1613_v39  ;;  %v1534_v38 = vpop.f32.mrf.mxu0 }
 0x206   : > { %v1565_v42 = vpop.f32.mrf.mxu1 }
 0x207   : > { %v1566_v14 = vadd.f32 %v1565_v42, %v1517_v3  ;;  %v1702_v61 = vmax.f32 %v1662_v59, 0.0  ;;  %v1530_v3 = vadd.f32 %v1529_v62, %v3815_v12  ;;  %v1532_v42 = vadd.f32 %v1531_v41, %v3815_v12 }
 0x208   : > { %v1619_v20 = vpop.f32.mrf.mxu2 }
 0x209   : > { %v1703_v15 = vmax.f32 %v1566_v14, 0.0  ;;  %v1620_v33 = vadd.f32 %v1619_v20, %v3819_v28 }
 0x20b   : > { %v1733_v45 = vpack.c.bf16 %v1703_v15, %v1701_v23 }
 0x20c   : > { %v1663_v46 = vpop.f32.mrf.mxu3 }
 0x20d   : > { %v1664_v18 = vadd.f32 %v1663_v46, %v1615_v32  ;;  %1887 = vmatmul.bf16.vlgmr.msrb.gmra.mxu0 %v1733_v45  ;;  %v1536_v20 = vpop.f32.mrf.mxu0 }
 0x20e   : > { %v1568_v21 = vpop.f32.mrf.mxu1 }
 0x20f   : > { %v1704_v47 = vmax.f32 %v1664_v18, 0.0  ;;  %v1569_v53 = vadd.f32 %v1568_v21, %v1520_v48 }
 0x210   : > { %v1622_v40 = vpop.f32.mrf.mxu2 }
 0x211   : > { %v1734_v58 = vpack.c.bf16 %v1704_v47, %v1702_v61  ;;  %v1705_v25 = vmax.f32 %v1569_v53, 0.0  ;;  %v1623_v54 = vadd.f32 %v1622_v40, %v3819_v28 }
 0x213   : > { %1936 = vmatmul.bf16.vlgmr.msrb.gmra.mxu1 %v1734_v58 }
 0x214   : > { %v1666_v0 = vpop.f32.mrf.mxu3 }
 0x215   : > { %v1667_v56 = vadd.f32 %v1666_v0, %v1618_v17  ;;  %v1539_v48 = vpop.f32.mrf.mxu0 }
 0x216   : > { %v1570_v57 = vpop.f32.mrf.mxu1 }
 0x217   : > { %v1571_v16 = vadd.f32 %v1570_v57, %v1522_v29  ;;  %v1706_v37 = vmax.f32 %v1667_v56, 0.0  ;;  %v1535_v29 = vadd.f32 %v1534_v38, %v3815_v12  ;;  %v1537_v57 = vadd.f32 %v1536_v20, %v3815_v12 }
 0x218   : > { %v1624_v30 = vpop.f32.mrf.mxu2 }
 0x219   : > { %v1707_v55 = vmax.f32 %v1571_v16, 0.0  ;;  %v1625_v10 = vadd.f32 %v1624_v30, %v3819_v28 }
 0x21b   : > { %v1735_v51 = vpack.c.bf16 %v1707_v55, %v1705_v25 }
 0x21c   : > { %v1668_v34 = vpop.f32.mrf.mxu3 }
 0x21d   : > { %v1669_v5 = vadd.f32 %v1668_v34, %v1620_v33  ;;  %1892 = vmatmul.bf16.gmra.mxu0 %v1735_v51  ;;  %v1541_v56 = vpop.f32.mrf.mxu0 }
 0x21e   : > { %v1573_v36 = vpop.f32.mrf.mxu1 }
 0x21f   : > { %v1708_v27 = vmax.f32 %v1669_v5, 0.0  ;;  %v1574_v43 = vadd.f32 %v1573_v36, %v1525_v50 }
 0x220   : > { %v1627_v44 = vpop.f32.mrf.mxu2 }
 0x221   : > { %v1736_v52 = vpack.c.bf16 %v1708_v27, %v1706_v37  ;;  %v1709_v9 = vmax.f32 %v1574_v43, 0.0  ;;  %v1628_v15 = vadd.f32 %v1627_v44, %v3819_v28 }
 0x223   : > { %1941 = vmatmul.bf16.gmra.mxu1 %v1736_v52 }
 0x224   : > { %v1671_v49 = vpop.f32.mrf.mxu3 }
 0x225   : > { %v1672_v26 = vadd.f32 %v1671_v49, %v1623_v54  ;;  %v1540_v49 = vadd.f32 %v1539_v48, %v3815_v12 }
 0x226   : > { %v1575_v35 = vpop.f32.mrf.mxu1 }
 0x227   : > { %v1576_v6 = vadd.f32 %v1575_v35, %v1527_v2  ;;  %v1710_v13 = vmax.f32 %v1672_v26, 0.0  ;;  %v1544_v2 = vpop.f32.mrf.mxu0  ;;  %v1542_v35 = vadd.f32 %v1541_v56, %v3815_v12 }
 0x228   : > { %v1629_v19 = vpop.f32.mrf.mxu2 }
 0x229   : > { %v1711_v31 = vmax.f32 %v1576_v6, 0.0  ;;  %v1630_v45 = vadd.f32 %v1629_v19, %v3819_v28 }
 0x22b   : > { %v1737_v22 = vpack.c.bf16 %v1711_v31, %v1709_v9 }
 0x22c   : > { %v1673_v8 = vpop.f32.mrf.mxu3 }
 0x22d   : > { %v1674_v4 = vadd.f32 %v1673_v8, %v1625_v10  ;;  %1897 = vmatmul.bf16.gmra.mxu0 %v1737_v22 }
 0x22e   : > { %v1578_v60 = vpop.f32.mrf.mxu1 }
 0x22f   : > { %v1712_v1 = vmax.f32 %v1674_v4, 0.0  ;;  %v1579_v14 = vadd.f32 %v1578_v60, %v1530_v3 }
 0x230   : > { %v1632_v24 = vpop.f32.mrf.mxu2 }
 0x231   : > { %v1738_v63 = vpack.c.bf16 %v1712_v1, %v1710_v13  ;;  %v1713_v32 = vmax.f32 %v1579_v14, 0.0  ;;  %v1633_v25 = vadd.f32 %v1632_v24, %v3819_v28  ;;  %v1546_v13 = vpop.f32.mrf.mxu0 }
 0x232   : > { %v1547_v20 = vadd.f32 %v1546_v13, %v3815_v12 }
 0x233   : > { %1946 = vmatmul.bf16.gmra.mxu1 %v1738_v63 }
 0x234   : > { %v1676_v7 = vpop.f32.mrf.mxu3 }
 0x235   : > { %v1677_v46 = vadd.f32 %v1676_v7, %v1628_v15  ;;  %v1545_v7 = vadd.f32 %v1544_v2, %v3815_v12 }
 0x236   : > { %v1580_v39 = vpop.f32.mrf.mxu1 }
 0x237   : > { %v1581_v23 = vadd.f32 %v1580_v39, %v1532_v42  ;;  %v1714_v40 = vmax.f32 %v1677_v46, 0.0 }
 0x238   : > { %v1634_v11 = vpop.f32.mrf.mxu2 }
 0x239   : > { %v1715_v59 = vmax.f32 %v1581_v23, 0.0  ;;  %v1635_v51 = vadd.f32 %v1634_v11, %v3819_v28 }
 0x23b   : > { %v1739_v18 = vpack.c.bf16 %v1715_v59, %v1713_v32  ;;  %v1549_v32 = vpop.f32.mrf.mxu0 }
 0x23c   : > { %v1678_v21 = vpop.f32.mrf.mxu3 }
 0x23d   : > { %v1679_v61 = vadd.f32 %v1678_v21, %v1630_v45  ;;  %1902 = vmatmul.bf16.gmra.mxu0 %v1739_v18 }
 0x23e   : > { %v1583_v47 = vpop.f32.mrf.mxu1 }
 0x23f   : > { %v1716_v58 = vmax.f32 %v1679_v61, 0.0  ;;  %v1584_v16 = vadd.f32 %v1583_v47, %v1535_v29 }
 0x240   : > { %v1637_v62 = vpop.f32.mrf.mxu2 }
 0x241   : > { %v1740_v0 = vpack.c.bf16 %v1716_v58, %v1714_v40  ;;  %v1717_v55 = vmax.f32 %v1584_v16, 0.0  ;;  %v1638_v9 = vadd.f32 %v1637_v62, %v3819_v28 }
 0x243   : > { %1951 = vmatmul.bf16.gmra.mxu1 %v1740_v0 }
 0x244   : > { %v1681_v53 = vpop.f32.mrf.mxu3 }
 0x245   : > { %v1682_v34 = vadd.f32 %v1681_v53, %v1633_v25  ;;  %v1551_v53 = vpop.f32.mrf.mxu0 }
 0x246   : > { %v1585_v30 = vpop.f32.mrf.mxu1  ;;  %v1552_v62 = vadd.f32 %v1551_v53, %v3815_v12 }
 0x247   : > { %v1586_v17 = vadd.f32 %v1585_v30, %v1537_v57  ;;  %v1718_v44 = vmax.f32 %v1682_v34, 0.0  ;;  %v1550_v57 = vadd.f32 %v1549_v32, %v3815_v12 }
 0x248   : > { %v1639_v41 = vpop.f32.mrf.mxu2 }
 0x249   : > { %v1719_v33 = vmax.f32 %v1586_v17, 0.0  ;;  %v1640_v22 = vadd.f32 %v1639_v41, %v3819_v28 }
 0x24b   : > { %v1741_v5 = vpack.c.bf16 %v1719_v33, %v1717_v55 }
 0x24c   : > { %v1683_v36 = vpop.f32.mrf.mxu3 }
 0x24d   : > { %v1684_v37 = vadd.f32 %v1683_v36, %v1635_v51  ;;  %1907 = vmatmul.bf16.gmra.mxu0 %v1741_v5 }
 0x24e   : > { %v1588_v27 = vpop.f32.mrf.mxu1 }
 0x24f   : > { %v1720_v52 = vmax.f32 %v1684_v37, 0.0  ;;  %v1589_v6 = vadd.f32 %v1588_v27, %v1540_v49 }
 0x250   : > { %v1642_v26 = vpop.f32.mrf.mxu2 }
 0x251   : > { %v1742_v50 = vpack.c.bf16 %v1720_v52, %v1718_v44  ;;  %v1721_v31 = vmax.f32 %v1589_v6, 0.0  ;;  %v1643_v59 = vadd.f32 %v1642_v26, %v3819_v28 }
 0x253   : > { %1956 = vmatmul.bf16.gmra.mxu1 %v1742_v50  ;;  %v3854_v50 = vld [vmem:[%s3903_s6] ss:$0 sm:$0xff] }
 0x254   : > { %v1686_v43 = vpop.f32.mrf.mxu3 }
 0x255   : > { %v1687_v38 = vadd.f32 %v1686_v43, %v1638_v9 }
 0x256   : > { %v1590_v19 = vpop.f32.mrf.mxu1 }
 0x257   : > { %v1591_v54 = vadd.f32 %v1590_v19, %v1542_v35  ;;  %v1722_v63 = vmax.f32 %v1687_v38, 0.0 }
 0x258   : > { %v1644_v42 = vpop.f32.mrf.mxu2 }
 0x259   : > { %v1723_v10 = vmax.f32 %v1591_v54, 0.0  ;;  %v1645_v18 = vadd.f32 %v1644_v42, %v3819_v28 }
 0x25b   : > { %v1743_v8 = vpack.c.bf16 %v1723_v10, %v1721_v31 }
 0x25c   : > { %v1688_v4 = vpop.f32.mrf.mxu3 }
 0x25d   : > { %v1689_v60 = vadd.f32 %v1688_v4, %v1640_v22  ;;  %1912 = vmatmul.bf16.gmra.mxu0 %v1743_v8 }
 0x25e   : > { %v1593_v1 = vpop.f32.mrf.mxu1 }
 0x25f   : > { %v1724_v24 = vmax.f32 %v1689_v60, 0.0  ;;  %v1594_v39 = vadd.f32 %v1593_v1, %v1545_v7 }
 0x260   : > { %v1647_v40 = vpop.f32.mrf.mxu2 }
 0x261   : > { %v1744_v3 = vpack.c.bf16 %v1724_v24, %v1722_v63  ;;  %v1725_v45 = vmax.f32 %v1594_v39, 0.0  ;;  %v1648_v33 = vadd.f32 %v1647_v40, %v3819_v28 }
 0x263   : > { %1961 = vmatmul.bf16.gmra.mxu1 %v1744_v3 }
 0x264   : > { %v1691_v14 = vpop.f32.mrf.mxu3 }
 0x265   : > { %v1692_v11 = vadd.f32 %v1691_v14, %v1643_v59 }
 0x266   : > { %v1595_v23 = vpop.f32.mrf.mxu1 }
 0x267   : > { %v1596_v15 = vadd.f32 %v1595_v23, %v1547_v20  ;;  %v1726_v48 = vmax.f32 %v1692_v11, 0.0 }
 0x268   : > { %v1649_v55 = vpop.f32.mrf.mxu2 }
 0x269   : > { %v1727_v46 = vmax.f32 %v1596_v15, 0.0  ;;  %v1650_v34 = vadd.f32 %v1649_v55, %v3819_v28 }
 0x26b   : > { %v1745_v21 = vpack.c.bf16 %v1727_v46, %v1725_v45 }
 0x26c   : > { %v1693_v61 = vpop.f32.mrf.mxu3 }
 0x26d   : > { %v1694_v47 = vadd.f32 %v1693_v61, %v1645_v18  ;;  %1917 = vmatmul.bf16.gmra.mxu0 %v1745_v21 }
 0x26e   : > { %v1598_v58 = vpop.f32.mrf.mxu1 }
 0x26f   : > { %v1728_v0 = vmax.f32 %v1694_v47, 0.0  ;;  %v1599_v30 = vadd.f32 %v1598_v58, %v1550_v57 }
 0x271   : > { %v1746_v29 = vpack.c.bf16 %v1728_v0, %v1726_v48  ;;  %v1729_v56 = vmax.f32 %v1599_v30, 0.0 }
 0x273   : > { %1966 = vmatmul.bf16.gmra.mxu1 %v1746_v29 }
 0x274   : > { %v1696_v16 = vpop.f32.mrf.mxu3 }
 0x275   : > { %v1697_v5 = vadd.f32 %v1696_v16, %v1648_v33 }
 0x276   : > { %v1600_v17 = vpop.f32.mrf.mxu1 }
 0x277   : > { %v1601_v25 = vadd.f32 %v1600_v17, %v1552_v62  ;;  %v1730_v44 = vmax.f32 %v1697_v5, 0.0 }
 0x279   : > { %v1731_v51 = vmax.f32 %v1601_v25, 0.0 }
 0x27b   : > { %v1747_v36 = vpack.c.bf16 %v1731_v51, %v1729_v56 }
 0x27c   : > { %v1698_v37 = vpop.f32.mrf.mxu3 }
 0x27d   : > { %v1699_v27 = vadd.f32 %v1698_v37, %v1650_v34  ;;  %1922 = vmatmul.bf16.gmra.mxu0 %v1747_v36 }
 0x27f   : > { %v1732_v52 = vmax.f32 %v1699_v27, 0.0 }
 0x281   : > { %v1748_v41 = vpack.c.bf16 %v1732_v52, %v1730_v44 }
 0x283   : > { %1971 = vmatmul.bf16.gmra.mxu1 %v1748_v41 }
 0x28a   : > { %v1888_v12 = vpop.f32.mrf.mxu0 }
 0x28b   : > { %v1889_v49 = vadd.f32 %v3854_v50, %v1888_v12 }
 0x290   : > { %v1937_v28 = vpop.f32.mrf.mxu1 }
 0x291   : > { %v1938_v2 = vadd.f32 %v1937_v28, %v1889_v49 }
 0x292   : > { %v1890_v43 = vpop.f32.mrf.mxu0 }
 0x293   : > { %1977 = vst [vmem:[%s3861_s23] sm:$0xff] %v1938_v2  ;;  %v1891_v35 = vadd.f32 %v3854_v50, %v1890_v43 }
 0x298   : > { %v1939_v6 = vpop.f32.mrf.mxu1 }
 0x299   : > { %v1940_v19 = vadd.f32 %v1939_v6, %v1891_v35 }
 0x29a   : > { %v1893_v54 = vpop.f32.mrf.mxu0 }
 0x29b   : > { %1978 = vst [vmem:[%s3861_s23 + $0x8] sm:$0xff] %v1940_v19  ;;  %v1894_v9 = vadd.f32 %v3854_v50, %v1893_v54 }
 0x2a0   : > { %v1942_v31 = vpop.f32.mrf.mxu1 }
 0x2a1   : > { %v1943_v10 = vadd.f32 %v1942_v31, %v1894_v9 }
 0x2a2   : > { %v1895_v26 = vpop.f32.mrf.mxu0 }
 0x2a3   : > { %1979 = vst [vmem:[%s3861_s23 + $0x10] sm:$0xff] %v1943_v10  ;;  %v1896_v22 = vadd.f32 %v3854_v50, %v1895_v26 }
 0x2a8   : > { %v1944_v38 = vpop.f32.mrf.mxu1 }
 0x2a9   : > { %v1945_v8 = vadd.f32 %v1944_v38, %v1896_v22 }
 0x2aa   : > { %v1898_v4 = vpop.f32.mrf.mxu0 }
 0x2ab   : > { %1980 = vst [vmem:[%s3861_s23 + $0x18] sm:$0xff] %v1945_v8  ;;  %v1899_v60 = vadd.f32 %v3854_v50, %v1898_v4 }
 0x2b0   : > { %v1947_v13 = vpop.f32.mrf.mxu1 }
 0x2b1   : > { %v1948_v1 = vadd.f32 %v1947_v13, %v1899_v60 }
 0x2b2   : > { %v1900_v63 = vpop.f32.mrf.mxu0 }
 0x2b3   : > { %1981 = vst [vmem:[%s3861_s23 + $0x20] sm:$0xff] %v1948_v1  ;;  %v1901_v24 = vadd.f32 %v3854_v50, %v1900_v63 }
 0x2b8   : > { %v1949_v3 = vpop.f32.mrf.mxu1 }
 0x2b9   : > { %v1950_v7 = vadd.f32 %v1949_v3, %v1901_v24 }
 0x2ba   : > { %v1903_v42 = vpop.f32.mrf.mxu0 }
 0x2bb   : > { %1982 = vst [vmem:[%s3861_s23 + $0x28] sm:$0xff] %v1950_v7  ;;  %v1904_v14 = vadd.f32 %v3854_v50, %v1903_v42 }
 0x2c0   : > { %v1952_v20 = vpop.f32.mrf.mxu1 }
 0x2c1   : > { %v1953_v39 = vadd.f32 %v1952_v20, %v1904_v14 }
 0x2c2   : > { %v1905_v23 = vpop.f32.mrf.mxu0 }
 0x2c3   : > { %1983 = vst [vmem:[%s3861_s23 + $0x30] sm:$0xff] %v1953_v39  ;;  %v1906_v15 = vadd.f32 %v3854_v50, %v1905_v23 }
 0x2c8   : > { %v1954_v32 = vpop.f32.mrf.mxu1 }
 0x2c9   : > { %v1955_v59 = vadd.f32 %v1954_v32, %v1906_v15 }
 0x2ca   : > { %v1908_v45 = vpop.f32.mrf.mxu0 }
 0x2cb   : > { %1984 = vst [vmem:[%s3861_s23 + $0x38] sm:$0xff] %v1955_v59  ;;  %v1909_v46 = vadd.f32 %v3854_v50, %v1908_v45 }
 0x2d0   : > { %v1957_v18 = vpop.f32.mrf.mxu1 }
 0x2d1   : > { %v1958_v11 = vadd.f32 %v1957_v18, %v1909_v46 }
 0x2d2   : > { %v1910_v21 = vpop.f32.mrf.mxu0 }
 0x2d3   : > { %1985 = vst [vmem:[%s3861_s23 + $0x40] sm:$0xff] %v1958_v11  ;;  %v1911_v61 = vadd.f32 %v3854_v50, %v1910_v21 }
 0x2d8   : > { %v1959_v47 = vpop.f32.mrf.mxu1 }
 0x2d9   : > { %v1960_v40 = vadd.f32 %v1959_v47, %v1911_v61 }
 0x2da   : > { %v1913_v58 = vpop.f32.mrf.mxu0 }
 0x2db   : > { %1986 = vst [vmem:[%s3861_s23 + $0x48] sm:$0xff] %v1960_v40  ;;  %v1914_v48 = vadd.f32 %v3854_v50, %v1913_v58 }
 0x2e0   : > { %v1962_v0 = vpop.f32.mrf.mxu1 }
 0x2e1   : > { %v1963_v29 = vadd.f32 %v1962_v0, %v1914_v48 }
 0x2e2   : > { %v1915_v53 = vpop.f32.mrf.mxu0 }
 0x2e3   : > { %1987 = vst [vmem:[%s3861_s23 + $0x50] sm:$0xff] %v1963_v29  ;;  %v1916_v57 = vadd.f32 %v3854_v50, %v1915_v53 }
 0x2e8   : > { %v1964_v16 = vpop.f32.mrf.mxu1 }
 0x2e9   : > { %v1965_v62 = vadd.f32 %v1964_v16, %v1916_v57 }
 0x2ea   : > { %v1918_v30 = vpop.f32.mrf.mxu0 }
 0x2eb   : > { %1988 = vst [vmem:[%s3861_s23 + $0x58] sm:$0xff] %v1965_v62  ;;  %v1919_v17 = vadd.f32 %v3854_v50, %v1918_v30 }
 0x2f0   : > { %v1967_v25 = vpop.f32.mrf.mxu1 }
 0x2f1   : > { %v1968_v55 = vadd.f32 %v1967_v25, %v1919_v17 }
 0x2f2   : > { %v1920_v33 = vpop.f32.mrf.mxu0 }
 0x2f3   : > { %1989 = vst [vmem:[%s3861_s23 + $0x60] sm:$0xff] %v1968_v55  ;;  %v1921_v56 = vadd.f32 %v3854_v50, %v1920_v33 }
 0x2f8   : > { %v1969_v51 = vpop.f32.mrf.mxu1 }
 0x2f9   : > { %v1970_v34 = vadd.f32 %v1969_v51, %v1921_v56 }
 0x2fa   : > { %v1923_v5 = vpop.f32.mrf.mxu0 }
 0x2fb   : > { %1990 = vst [vmem:[%s3861_s23 + $0x68] sm:$0xff] %v1970_v34  ;;  %v1924_v36 = vadd.f32 %v3854_v50, %v1923_v5 }
 0x300   : > { %v1972_v37 = vpop.f32.mrf.mxu1 }
 0x301   : > { %v1973_v27 = vadd.f32 %v1972_v37, %v1924_v36 }
 0x302   : > { %v1925_v44 = vpop.f32.mrf.mxu0 }
 0x303   : > { %1991 = vst [vmem:[%s3861_s23 + $0x70] sm:$0xff] %v1973_v27  ;;  %v1926_v52 = vadd.f32 %v3854_v50, %v1925_v44 }
 0x308   : > { %v1974_v41 = vpop.f32.mrf.mxu1 }
 0x309   : > { %v1975_v12 = vadd.f32 %v1974_v41, %v1926_v52 }
 0x30b   : > { %1992 = vst [vmem:[%s3861_s23 + $0x78] sm:$0xff] %v1975_v12 }
 0x30c PF: > { %s17_s24 = sadd.s32 1, %s2813_s24  }
 0x30d   : > { %p14_p4 = scmp.ge.s32.totalorder %s17_s24, 4  }
 0x30f   :  { %16 = sbr.rel (!%p14_p4) target bundleno = 1 (0x1), region = 78 }

</bundles_post_ra>
